<compile_context>
chip_gen: v5e
topology: v5e:2x2
jax: 0.10.0
libtpu: 0.0.40
codegen_flags: <defaults>
</compile_context>

<pallas_src>
import functools

import jax
import jax.numpy as jnp
from jax import lax
from jax.experimental import pallas as pl
from jax.experimental.pallas import tpu as pltpu


def _fold_bn(gamma, beta, mean, var, eps=1e-5):
    scale = gamma / jnp.sqrt(var + eps)
    bias = beta - mean * scale
    return scale, bias


def _prep_conv_w(w_oihw, scale, cout, cp):
    # (O, I, 3, 3) -> (kh, kw, I, O), fold BN scale into output channels,
    # pad O -> cp (lane-dense), then K-stack the kw taps: (3, 3*I, cp) bf16.
    w = jnp.transpose(w_oihw, (2, 3, 1, 0)) * scale          # (3, 3, I, O)
    w = jnp.pad(w, ((0, 0), (0, 0), (0, 0), (0, cp - cout)))
    return w.reshape(3, 3 * w.shape[2], cp).astype(jnp.bfloat16)


def _prep_bias(b, cout, cp):
    return jnp.pad(b, (0, cp - cout)).reshape(1, cp).astype(jnp.float32)


def _resblock_kernel(*refs, S, W, Cin, Cp, has_downsample):
    if has_downsample:
        x_ref, w1_ref, b1_ref, w2_ref, b2_ref, wd_ref, bd_ref, o_ref = refs
    else:
        x_ref, w1_ref, b1_ref, w2_ref, b2_ref, o_ref = refs

    strip = pl.program_id(1)
    n_strips = pl.num_programs(1)

    # x strip: (S+4, W, 3*Cin) f32, channels dx-stacked by the wrapper.
    xk = x_ref[0]
    xkb = xk.astype(jnp.bfloat16)                 # single bf16 cast (review #3)

    # ---- conv1 (+ folded bn1 scale) over S+2 rows (1-row halo each side) ----
    # K-stacked: 3 matmuls of K=3*Cin instead of 9 of K=Cin (review #5).
    h1 = jnp.dot(xkb[0:S + 2].reshape((S + 2) * W, 3 * Cin), w1_ref[0],
                 preferred_element_type=jnp.float32)
    for dy in range(1, 3):
        patch = xkb[dy:dy + S + 2].reshape((S + 2) * W, 3 * Cin)
        h1 = h1 + jnp.dot(patch, w1_ref[dy], preferred_element_type=jnp.float32)
    h1 = jnp.maximum(h1 + b1_ref[...], 0.0).reshape(S + 2, W, Cp)

    # conv2's zero padding along H exists only at the true image border: halo
    # rows that fall outside the image must be forced to zero (the bias would
    # otherwise make them nonzero).
    row = lax.broadcasted_iota(jnp.int32, (S + 2, W, Cp), 0)
    keep = jnp.logical_and(
        jnp.logical_or(row > 0, strip > 0),
        jnp.logical_or(row < S + 1, strip < n_strips - 1))
    h1 = jnp.where(keep, h1, 0.0)

    # Dropout2d is identity in eval mode.
    # TODO(synk): training-mode channel dropout (needs RNG mask) not implemented.

    # ---- conv2 (+ folded bn2 scale) ----
    h1b = h1.astype(jnp.bfloat16)                 # single bf16 cast
    zcol = jnp.zeros((S + 2, 1, Cp), jnp.bfloat16)
    h1p = jnp.concatenate([zcol, h1b, zcol], axis=1)        # (S+2, W+2, Cp)

    def conv2_patch(dy):
        # Lane-aligned K-stack of the 3 dx taps: (S, W, 3*Cp).
        return jnp.concatenate(
            [h1p[dy:dy + S, dx:dx + W, :] for dx in range(3)],
            axis=-1).reshape(S * W, 3 * Cp)

    h2 = jnp.dot(conv2_patch(0), w2_ref[0], preferred_element_type=jnp.float32)
    for dy in range(1, 3):
        h2 = h2 + jnp.dot(conv2_patch(dy), w2_ref[dy],
                          preferred_element_type=jnp.float32)
    h2 = h2 + b2_ref[...]

    # ---- residual branch (exact f32 input: the dx=1 channel block of xk) ----
    xres = xk[2:2 + S, :, Cin:2 * Cin].reshape(S * W, Cin)
    if has_downsample:
        ident = jnp.dot(xres.astype(jnp.bfloat16), wd_ref[...],
                        preferred_element_type=jnp.float32) + bd_ref[...]
    elif Cp > Cin:
        ident = jnp.concatenate(
            [xres, jnp.zeros((S * W, Cp - Cin), jnp.float32)], axis=-1)
    else:
        ident = xres

    out = jnp.maximum(h2 + ident, 0.0)
    o_ref[0] = out.reshape(S, W, Cp).astype(o_ref.dtype)


def _vmem_budget_bytes(S, W, Cin, Cp):
    # Rough per-step footprint: double-buffered in/out blocks + weights + live
    # values, with headroom; clamped to [32 MiB, 64 MiB] (v7x-safe, review #2).
    blk_in = (S + 4) * W * 3 * Cin * 4
    blk_out = S * W * Cp * 4
    weights = (9 * Cin * Cp + 9 * Cp * Cp + Cin * Cp) * 2 + 3 * Cp * 4
    live = ((S + 4) * W * 3 * Cin * 6
            + (S + 2) * W * Cp * 10
            + S * W * 3 * Cp * 2
            + 2 * S * W * Cp * 4)
    est = 2 * (blk_in + blk_out) + 2 * weights + live
    return int(min(max(2 * est, 32 * 2 ** 20), 64 * 2 ** 20))


def resblock_pallas_nhwc(x_nhwc, params, *, strip_rows=32,
                         out_dtype=jnp.float32):
    """ResBlock forward (stride=1, eval mode). x_nhwc: (B, H, W, Cin) f32."""
    B, H, W, Cin = x_nhwc.shape
    Cout = params["w1"].shape[0]
    has_downsample = Cin != Cout
    Cp = ((Cout + 127) // 128) * 128            # lane-dense padded out channels

    S = strip_rows if (strip_rows > 0 and H % strip_rows == 0) else H
    n_strips = H // S

    x = x_nhwc.astype(jnp.float32)
    # Spatial pad: 2 rows each side (conv1 halo + conv2 halo), 1 col each side.
    xp = jnp.pad(x, ((0, 0), (2, 2), (1, 1), (0, 0)))        # (B, H+4, W+2, Cin)
    # dx-stacked channels (wrapper-side im2col over kw) -> K=3*Cin per dy tap.
    xk = jnp.concatenate([xp[:, :, dx:dx + W, :] for dx in range(3)], axis=-1)
    # Overlapping row strips with halo, materialised in HBM (robust halo
    # without overlapping BlockSpecs); (S+4)/S duplication overhead.
    xs = jnp.stack([xk[:, s * S:s * S + S + 4] for s in range(n_strips)],
                   axis=1).reshape(B * n_strips, S + 4, W, 3 * Cin)

    s1, b1 = _fold_bn(params["bn1_g"], params["bn1_b"],
                      params["bn1_m"], params["bn1_v"])
    s2, b2 = _fold_bn(params["bn2_g"], params["bn2_b"],
                      params["bn2_m"], params["bn2_v"])

    w1_k = _prep_conv_w(params["w1"], s1, Cout, Cp)          # (3, 3*Cin, Cp)
    w2_k = _prep_conv_w(params["w2"], s2, Cout, Cp)          # (3, 3*Cout->Cp? no: 3*Cout, Cp)
    b1_p = _prep_bias(b1, Cout, Cp)
    b2_p = _prep_bias(b2, Cout, Cp)

    # conv2 acts on the Cp-padded h1, so its K dim must be 3*Cp (pad with zeros).
    if Cp > Cout:
        w2_full = jnp.zeros((3, 3 * Cp, Cp), jnp.bfloat16)
        for dx in range(3):
            w2_full = w2_full.at[:, dx * Cp:dx * Cp + Cout, :].set(
                w2_k[:, dx * Cout:(dx + 1) * Cout, :])
        w2_k = w2_full

    inputs = [xs, w1_k, b1_p, w2_k, b2_p]
    in_specs = [
        pl.BlockSpec((1, S + 4, W, 3 * Cin),
                     lambda b, i: (b * n_strips + i, 0, 0, 0)),
        pl.BlockSpec((3, 3 * Cin, Cp), lambda b, i: (0, 0, 0)),
        pl.BlockSpec((1, Cp), lambda b, i: (0, 0)),
        pl.BlockSpec((3, 3 * Cp, Cp), lambda b, i: (0, 0, 0)),
        pl.BlockSpec((1, Cp), lambda b, i: (0, 0)),
    ]
    if has_downsample:
        sd, bd = _fold_bn(params["bnd_g"], params["bnd_b"],
                          params["bnd_m"], params["bnd_v"])
        wd = jnp.transpose(params["wd"][:, :, 0, 0], (1, 0)) * sd   # (Cin, Cout)
        wd_k = jnp.pad(wd, ((0, 0), (0, Cp - Cout))).astype(jnp.bfloat16)
        bd_p = _prep_bias(bd, Cout, Cp)
        inputs += [wd_k, bd_p]
        in_specs += [pl.BlockSpec((Cin, Cp), lambda b, i: (0, 0)),
                     pl.BlockSpec((1, Cp), lambda b, i: (0, 0))]

    kernel = functools.partial(_resblock_kernel, S=S, W=W, Cin=Cin, Cp=Cp,
                               has_downsample=has_downsample)

    out_padded = pl.pallas_call(
        kernel,
        out_shape=jax.ShapeDtypeStruct((B, H, W, Cp), out_dtype),
        grid=(B, n_strips),
        in_specs=in_specs,
        out_specs=pl.BlockSpec((1, S, W, Cp), lambda b, i: (b, i, 0, 0)),
        compiler_params=pltpu.CompilerParams(
            dimension_semantics=("parallel", "parallel"),
            vmem_limit_bytes=_vmem_budget_bytes(S, W, Cin, Cp)),
    )(*inputs)

    return out_padded[..., :Cout]


def resblock_pallas(x_nchw, params, **kwargs):
    """NCHW wrapper (PyTorch convention)."""
    x_nhwc = jnp.transpose(x_nchw, (0, 2, 3, 1))
    out = resblock_pallas_nhwc(x_nhwc, params, **kwargs)
    return jnp.transpose(out, (0, 3, 1, 2))


def resblock_reference(x_nchw, params):
    """Pure-JAX f32 reference (eval-mode BN / identity dropout)."""
    Cin = x_nchw.shape[1]
    Cout = params["w1"].shape[0]
    x = jnp.transpose(x_nchw, (0, 2, 3, 1))
    dn = ("NHWC", "HWIO", "NHWC")

    def conv(x, w_oihw, pad):
        w = jnp.transpose(w_oihw, (2, 3, 1, 0))  # HWIO
        return lax.conv_general_dilated(x, w, (1, 1), pad, dimension_numbers=dn)

    s1, b1 = _fold_bn(params["bn1_g"], params["bn1_b"],
                      params["bn1_m"], params["bn1_v"])
    s2, b2 = _fold_bn(params["bn2_g"], params["bn2_b"],
                      params["bn2_m"], params["bn2_v"])

    h = conv(x, params["w1"], ((1, 1), (1, 1))) * s1 + b1
    h = jnp.maximum(h, 0.0)
    h = conv(h, params["w2"], ((1, 1), (1, 1))) * s2 + b2

    if Cin != Cout:
        sd, bd = _fold_bn(params["bnd_g"], params["bnd_b"],
                          params["bnd_m"], params["bnd_v"])
        ident = conv(x, params["wd"], ((0, 0), (0, 0))) * sd + bd
    else:
        ident = x

    out = jnp.maximum(h + ident, 0.0)
    return jnp.transpose(out, (0, 3, 1, 2))


def init_params(key, in_ch, out_ch):
    ks = jax.random.split(key, 16)
    p = {
        "w1": 0.1 * jax.random.normal(ks[0], (out_ch, in_ch, 3, 3), jnp.float32),
        "bn1_g": jax.random.uniform(ks[1], (out_ch,), minval=0.5, maxval=1.5),
        "bn1_b": 0.1 * jax.random.normal(ks[2], (out_ch,)),
        "bn1_m": 0.1 * jax.random.normal(ks[3], (out_ch,)),
        "bn1_v": jax.random.uniform(ks[4], (out_ch,), minval=0.5, maxval=1.5),
        "w2": 0.1 * jax.random.normal(ks[5], (out_ch, out_ch, 3, 3), jnp.float32),
        "bn2_g": jax.random.uniform(ks[6], (out_ch,), minval=0.5, maxval=1.5),
        "bn2_b": 0.1 * jax.random.normal(ks[7], (out_ch,)),
        "bn2_m": 0.1 * jax.random.normal(ks[8], (out_ch,)),
        "bn2_v": jax.random.uniform(ks[9], (out_ch,), minval=0.5, maxval=1.5),
    }
    if in_ch != out_ch:
        p.update({
            "wd": 0.1 * jax.random.normal(ks[10], (out_ch, in_ch, 1, 1), jnp.float32),
            "bnd_g": jax.random.uniform(ks[11], (out_ch,), minval=0.5, maxval=1.5),
            "bnd_b": 0.1 * jax.random.normal(ks[12], (out_ch,)),
            "bnd_m": 0.1 * jax.random.normal(ks[13], (out_ch,)),
            "bnd_v": jax.random.uniform(ks[14], (out_ch,), minval=0.5, maxval=1.5),
        })
    return p


if __name__ == "__main__":
    B, Cin, Cout, H, W = 2, 4, 8, 16, 16
    key = jax.random.PRNGKey(0)
    kx, kp = jax.random.split(key)
    x = jax.random.normal(kx, (B, Cin, H, W), jnp.float32)
    params = init_params(kp, Cin, Cout)

    # strip_rows=8 -> 2 row strips per image (exercises the halo / edge masking).
    out = jax.block_until_ready(resblock_pallas(x, params, strip_rows=8))
    ref = jax.block_until_ready(resblock_reference(x, params))

    assert out.shape == (B, Cout, H, W), out.shape
    assert bool(jnp.all(jnp.isfinite(out))), "non-finite kernel output"
    # bf16 MXU operands with f32 accumulation: use a relative L2 error check.
    rel = float(jnp.linalg.norm((out - ref).ravel())
                / (jnp.linalg.norm(ref.ravel()) + 1e-12))
    assert rel < 2e-2, rel
    print("KERNEL_OK")
</pallas_src>

<mosaic_0001>
module attributes {stable_mosaic.version = 11 : i64} {
  func.func @_resblock_kernel(%arg0: i32, %arg1: i32, %arg2: memref<1x12x16x12xf32, #tpu.memory_space<vmem>>, %arg3: memref<3x12x128xbf16, #tpu.memory_space<vmem>>, %arg4: memref<1x128xf32, #tpu.memory_space<vmem>>, %arg5: memref<3x384x128xbf16, #tpu.memory_space<vmem>>, %arg6: memref<1x128xf32, #tpu.memory_space<vmem>>, %arg7: memref<4x128xbf16, #tpu.memory_space<vmem>>, %arg8: memref<1x128xf32, #tpu.memory_space<vmem>>, %arg9: memref<1x8x16x128xf32, #tpu.memory_space<vmem>>) attributes {dimension_semantics = [#tpu.dimension_semantics<parallel>, #tpu.dimension_semantics<parallel>], iteration_bounds = array<i64: 2, 2>, scalar_prefetch = 0 : i64, scratch_operands = 0 : i64, tpu.core_type = #tpu.core_type<tc>, window_params = [{transform_indices = @transform_0, window_bounds = array<i64: 1, 12, 16, 12>}, {pipeline_mode = #tpu.pipeline_mode<synchronous>, transform_indices = @transform_1, window_bounds = array<i64: 3, 12, 128>}, {pipeline_mode = #tpu.pipeline_mode<synchronous>, transform_indices = @transform_2, window_bounds = array<i64: 1, 128>}, {pipeline_mode = #tpu.pipeline_mode<synchronous>, transform_indices = @transform_3, window_bounds = array<i64: 3, 384, 128>}, {pipeline_mode = #tpu.pipeline_mode<synchronous>, transform_indices = @transform_4, window_bounds = array<i64: 1, 128>}, {pipeline_mode = #tpu.pipeline_mode<synchronous>, transform_indices = @transform_5, window_bounds = array<i64: 4, 128>}, {pipeline_mode = #tpu.pipeline_mode<synchronous>, transform_indices = @transform_6, window_bounds = array<i64: 1, 128>}, {transform_indices = @transform_7, window_bounds = array<i64: 1, 8, 16, 128>}]} {
    %c0 = arith.constant 0 : index
    %c0_0 = arith.constant 0 : index
    %c0_1 = arith.constant 0 : index
    %c0_2 = arith.constant 0 : index
    %0 = vector.load %arg2[%c0, %c0_0, %c0_1, %c0_2] : memref<1x12x16x12xf32, #tpu.memory_space<vmem>>, vector<1x12x16x12xf32>
    %1 = vector.shape_cast %0 : vector<1x12x16x12xf32> to vector<12x16x12xf32>
    %2 = arith.truncf %1 : vector<12x16x12xf32> to vector<12x16x12xbf16>
    %3 = vector.extract_strided_slice %2 {offsets = [0, 0, 0], sizes = [10, 16, 12], strides = [1, 1, 1]} : vector<12x16x12xbf16> to vector<10x16x12xbf16>
    %4 = vector.shape_cast %3 : vector<10x16x12xbf16> to vector<160x12xbf16>
    %c0_3 = arith.constant 0 : index
    %c0_4 = arith.constant 0 : index
    %c0_5 = arith.constant 0 : index
    %5 = vector.load %arg3[%c0_3, %c0_4, %c0_5] : memref<3x12x128xbf16, #tpu.memory_space<vmem>>, vector<1x12x128xbf16>
    %6 = vector.shape_cast %5 : vector<1x12x128xbf16> to vector<12x128xbf16>
    %cst = arith.constant dense<0.000000e+00> : vector<160x128xf32>
    %7 = tpu.matmul %4, %6, %cst {dimension_numbers = #tpu.dot_dimension_numbers<[1], [0], [0], [1], [0, 0, 1, 1], [], []>} : vector<160x12xbf16>, vector<12x128xbf16>, vector<160x128xf32> -> vector<160x128xf32>
    %8 = vector.extract_strided_slice %2 {offsets = [1, 0, 0], sizes = [10, 16, 12], strides = [1, 1, 1]} : vector<12x16x12xbf16> to vector<10x16x12xbf16>
    %9 = vector.shape_cast %8 : vector<10x16x12xbf16> to vector<160x12xbf16>
    %c1 = arith.constant 1 : index
    %c0_6 = arith.constant 0 : index
    %c0_7 = arith.constant 0 : index
    %10 = vector.load %arg3[%c1, %c0_6, %c0_7] : memref<3x12x128xbf16, #tpu.memory_space<vmem>>, vector<1x12x128xbf16>
    %11 = vector.shape_cast %10 : vector<1x12x128xbf16> to vector<12x128xbf16>
    %cst_8 = arith.constant dense<0.000000e+00> : vector<160x128xf32>
    %12 = tpu.matmul %9, %11, %cst_8 {dimension_numbers = #tpu.dot_dimension_numbers<[1], [0], [0], [1], [0, 0, 1, 1], [], []>} : vector<160x12xbf16>, vector<12x128xbf16>, vector<160x128xf32> -> vector<160x128xf32>
    %13 = arith.addf %7, %12 : vector<160x128xf32>
    %14 = vector.extract_strided_slice %2 {offsets = [2, 0, 0], sizes = [10, 16, 12], strides = [1, 1, 1]} : vector<12x16x12xbf16> to vector<10x16x12xbf16>
    %15 = vector.shape_cast %14 : vector<10x16x12xbf16> to vector<160x12xbf16>
    %c2 = arith.constant 2 : index
    %c0_9 = arith.constant 0 : index
    %c0_10 = arith.constant 0 : index
    %16 = vector.load %arg3[%c2, %c0_9, %c0_10] : memref<3x12x128xbf16, #tpu.memory_space<vmem>>, vector<1x12x128xbf16>
    %17 = vector.shape_cast %16 : vector<1x12x128xbf16> to vector<12x128xbf16>
    %cst_11 = arith.constant dense<0.000000e+00> : vector<160x128xf32>
    %18 = tpu.matmul %15, %17, %cst_11 {dimension_numbers = #tpu.dot_dimension_numbers<[1], [0], [0], [1], [0, 0, 1, 1], [], []>} : vector<160x12xbf16>, vector<12x128xbf16>, vector<160x128xf32> -> vector<160x128xf32>
    %19 = arith.addf %13, %18 : vector<160x128xf32>
    %c0_12 = arith.constant 0 : index
    %c0_13 = arith.constant 0 : index
    %20 = vector.load %arg4[%c0_12, %c0_13] : memref<1x128xf32, #tpu.memory_space<vmem>>, vector<1x128xf32>
    %21 = vector.broadcast %20 : vector<1x128xf32> to vector<160x128xf32>
    %22 = arith.addf %19, %21 : vector<160x128xf32>
    %cst_14 = arith.constant 0.000000e+00 : f32
    %23 = vector.broadcast %cst_14 : f32 to vector<160x128xf32>
    %24 = arith.maximumf %22, %23 : vector<160x128xf32>
    %25 = vector.shape_cast %24 : vector<160x128xf32> to vector<10x16x128xf32>
    %26 = tpu.iota {dimensions = array<i32: 0>} : vector<10x16x128xi32>
    %c0_i32 = arith.constant 0 : i32
    %27 = vector.broadcast %c0_i32 : i32 to vector<10x16x128xi32>
    %28 = arith.cmpi sgt, %26, %27 : vector<10x16x128xi32>
    %c0_i32_15 = arith.constant 0 : i32
    %29 = arith.cmpi sgt, %arg1, %c0_i32_15 : i32
    %30 = vector.broadcast %29 : i1 to vector<10x16x128xi1>
    %31 = arith.ori %28, %30 : vector<10x16x128xi1>
    %c9_i32 = arith.constant 9 : i32
    %32 = vector.broadcast %c9_i32 : i32 to vector<10x16x128xi32>
    %33 = arith.cmpi slt, %26, %32 : vector<10x16x128xi32>
    %c1_i32 = arith.constant 1 : i32
    %34 = arith.cmpi slt, %arg1, %c1_i32 : i32
    %35 = vector.broadcast %34 : i1 to vector<10x16x128xi1>
    %36 = arith.ori %33, %35 : vector<10x16x128xi1>
    %37 = arith.andi %31, %36 : vector<10x16x128xi1>
    %cst_16 = arith.constant 0.000000e+00 : f32
    %38 = vector.broadcast %cst_16 : f32 to vector<10x16x128xf32>
    %39 = arith.select %37, %25, %38 : vector<10x16x128xi1>, vector<10x16x128xf32>
    %40 = arith.truncf %39 : vector<10x16x128xf32> to vector<10x16x128xbf16>
    %cst_17 = arith.constant 0.000000e+00 : bf16
    %41 = vector.broadcast %cst_17 : bf16 to vector<10x1x128xbf16>
    %42 = tpu.concatenate %41, %40, %41 in 1 : vector<10x1x128xbf16>, vector<10x16x128xbf16>, vector<10x1x128xbf16> -> vector<10x18x128xbf16>
    %43 = vector.extract_strided_slice %42 {offsets = [0, 0, 0], sizes = [8, 16, 128], strides = [1, 1, 1]} : vector<10x18x128xbf16> to vector<8x16x128xbf16>
    %44 = vector.extract_strided_slice %42 {offsets = [0, 1, 0], sizes = [8, 16, 128], strides = [1, 1, 1]} : vector<10x18x128xbf16> to vector<8x16x128xbf16>
    %45 = vector.extract_strided_slice %42 {offsets = [0, 2, 0], sizes = [8, 16, 128], strides = [1, 1, 1]} : vector<10x18x128xbf16> to vector<8x16x128xbf16>
    %46 = tpu.concatenate %43, %44, %45 in 2 : vector<8x16x128xbf16>, vector<8x16x128xbf16>, vector<8x16x128xbf16> -> vector<8x16x384xbf16>
    %47 = vector.shape_cast %46 : vector<8x16x384xbf16> to vector<128x384xbf16>
    %c0_18 = arith.constant 0 : index
    %c0_19 = arith.constant 0 : index
    %c0_20 = arith.constant 0 : index
    %48 = vector.load %arg5[%c0_18, %c0_19, %c0_20] : memref<3x384x128xbf16, #tpu.memory_space<vmem>>, vector<1x384x128xbf16>
    %49 = vector.shape_cast %48 : vector<1x384x128xbf16> to vector<384x128xbf16>
    %cst_21 = arith.constant dense<0.000000e+00> : vector<128x128xf32>
    %50 = tpu.matmul %47, %49, %cst_21 {dimension_numbers = #tpu.dot_dimension_numbers<[1], [0], [0], [1], [0, 0, 1, 1], [], []>} : vector<128x384xbf16>, vector<384x128xbf16>, vector<128x128xf32> -> vector<128x128xf32>
    %51 = vector.extract_strided_slice %42 {offsets = [1, 0, 0], sizes = [8, 16, 128], strides = [1, 1, 1]} : vector<10x18x128xbf16> to vector<8x16x128xbf16>
    %52 = vector.extract_strided_slice %42 {offsets = [1, 1, 0], sizes = [8, 16, 128], strides = [1, 1, 1]} : vector<10x18x128xbf16> to vector<8x16x128xbf16>
    %53 = vector.extract_strided_slice %42 {offsets = [1, 2, 0], sizes = [8, 16, 128], strides = [1, 1, 1]} : vector<10x18x128xbf16> to vector<8x16x128xbf16>
    %54 = tpu.concatenate %51, %52, %53 in 2 : vector<8x16x128xbf16>, vector<8x16x128xbf16>, vector<8x16x128xbf16> -> vector<8x16x384xbf16>
    %55 = vector.shape_cast %54 : vector<8x16x384xbf16> to vector<128x384xbf16>
    %c1_22 = arith.constant 1 : index
    %c0_23 = arith.constant 0 : index
    %c0_24 = arith.constant 0 : index
    %56 = vector.load %arg5[%c1_22, %c0_23, %c0_24] : memref<3x384x128xbf16, #tpu.memory_space<vmem>>, vector<1x384x128xbf16>
    %57 = vector.shape_cast %56 : vector<1x384x128xbf16> to vector<384x128xbf16>
    %cst_25 = arith.constant dense<0.000000e+00> : vector<128x128xf32>
    %58 = tpu.matmul %55, %57, %cst_25 {dimension_numbers = #tpu.dot_dimension_numbers<[1], [0], [0], [1], [0, 0, 1, 1], [], []>} : vector<128x384xbf16>, vector<384x128xbf16>, vector<128x128xf32> -> vector<128x128xf32>
    %59 = arith.addf %50, %58 : vector<128x128xf32>
    %60 = vector.extract_strided_slice %42 {offsets = [2, 0, 0], sizes = [8, 16, 128], strides = [1, 1, 1]} : vector<10x18x128xbf16> to vector<8x16x128xbf16>
    %61 = vector.extract_strided_slice %42 {offsets = [2, 1, 0], sizes = [8, 16, 128], strides = [1, 1, 1]} : vector<10x18x128xbf16> to vector<8x16x128xbf16>
    %62 = vector.extract_strided_slice %42 {offsets = [2, 2, 0], sizes = [8, 16, 128], strides = [1, 1, 1]} : vector<10x18x128xbf16> to vector<8x16x128xbf16>
    %63 = tpu.concatenate %60, %61, %62 in 2 : vector<8x16x128xbf16>, vector<8x16x128xbf16>, vector<8x16x128xbf16> -> vector<8x16x384xbf16>
    %64 = vector.shape_cast %63 : vector<8x16x384xbf16> to vector<128x384xbf16>
    %c2_26 = arith.constant 2 : index
    %c0_27 = arith.constant 0 : index
    %c0_28 = arith.constant 0 : index
    %65 = vector.load %arg5[%c2_26, %c0_27, %c0_28] : memref<3x384x128xbf16, #tpu.memory_space<vmem>>, vector<1x384x128xbf16>
    %66 = vector.shape_cast %65 : vector<1x384x128xbf16> to vector<384x128xbf16>
    %cst_29 = arith.constant dense<0.000000e+00> : vector<128x128xf32>
    %67 = tpu.matmul %64, %66, %cst_29 {dimension_numbers = #tpu.dot_dimension_numbers<[1], [0], [0], [1], [0, 0, 1, 1], [], []>} : vector<128x384xbf16>, vector<384x128xbf16>, vector<128x128xf32> -> vector<128x128xf32>
    %68 = arith.addf %59, %67 : vector<128x128xf32>
    %c0_30 = arith.constant 0 : index
    %c0_31 = arith.constant 0 : index
    %69 = vector.load %arg6[%c0_30, %c0_31] : memref<1x128xf32, #tpu.memory_space<vmem>>, vector<1x128xf32>
    %70 = vector.broadcast %69 : vector<1x128xf32> to vector<128x128xf32>
    %71 = arith.addf %68, %70 : vector<128x128xf32>
    %72 = vector.extract_strided_slice %1 {offsets = [2, 0, 4], sizes = [8, 16, 4], strides = [1, 1, 1]} : vector<12x16x12xf32> to vector<8x16x4xf32>
    %73 = vector.shape_cast %72 : vector<8x16x4xf32> to vector<128x4xf32>
    %74 = arith.truncf %73 : vector<128x4xf32> to vector<128x4xbf16>
    %c0_32 = arith.constant 0 : index
    %c0_33 = arith.constant 0 : index
    %75 = vector.load %arg7[%c0_32, %c0_33] : memref<4x128xbf16, #tpu.memory_space<vmem>>, vector<4x128xbf16>
    %cst_34 = arith.constant dense<0.000000e+00> : vector<128x128xf32>
    %76 = tpu.matmul %74, %75, %cst_34 {dimension_numbers = #tpu.dot_dimension_numbers<[1], [0], [0], [1], [0, 0, 1, 1], [], []>} : vector<128x4xbf16>, vector<4x128xbf16>, vector<128x128xf32> -> vector<128x128xf32>
    %c0_35 = arith.constant 0 : index
    %c0_36 = arith.constant 0 : index
    %77 = vector.load %arg8[%c0_35, %c0_36] : memref<1x128xf32, #tpu.memory_space<vmem>>, vector<1x128xf32>
    %78 = vector.broadcast %77 : vector<1x128xf32> to vector<128x128xf32>
    %79 = arith.addf %76, %78 : vector<128x128xf32>
    %80 = arith.addf %71, %79 : vector<128x128xf32>
    %cst_37 = arith.constant 0.000000e+00 : f32
    %81 = vector.broadcast %cst_37 : f32 to vector<128x128xf32>
    %82 = arith.maximumf %80, %81 : vector<128x128xf32>
    %83 = vector.shape_cast %82 : vector<128x128xf32> to vector<8x16x128xf32>
    %c0_38 = arith.constant 0 : index
    %c0_39 = arith.constant 0 : index
    %c0_40 = arith.constant 0 : index
    %c0_41 = arith.constant 0 : index
    %84 = vector.load %arg9[%c0_38, %c0_39, %c0_40, %c0_41] : memref<1x8x16x128xf32, #tpu.memory_space<vmem>>, vector<1x8x16x128xf32>
    %85 = vector.shape_cast %84 : vector<1x8x16x128xf32> to vector<8x16x128xf32>
    %86 = vector.shape_cast %83 : vector<8x16x128xf32> to vector<1x8x16x128xf32>
    tpu.vector_store %arg9[%c0_38, %c0_39, %c0_40, %c0_41], %86 {strides = array<i32>} : memref<1x8x16x128xf32, #tpu.memory_space<vmem>>, vector<1x8x16x128xf32>,
    return
  }
  func.func @transform_0(%arg0: i32, %arg1: i32) -> (i32, i32, i32, i32) {
    %c2_i32 = arith.constant 2 : i32
    %0 = arith.muli %arg0, %c2_i32 : i32
    %1 = arith.addi %0, %arg1 : i32
    %c0_i32 = arith.constant 0 : i32
    %c0_i32_0 = arith.constant 0 : i32
    %c0_i32_1 = arith.constant 0 : i32
    %c0_i32_2 = arith.constant 0 : i32
    return %1, %c0_i32, %c0_i32_0, %c0_i32_1 : i32, i32, i32, i32
  }
  func.func @transform_1(%arg0: i32, %arg1: i32) -> (i32, i32, i32) {
    %c0_i32 = arith.constant 0 : i32
    %c0_i32_0 = arith.constant 0 : i32
    %c0_i32_1 = arith.constant 0 : i32
    %c0_i32_2 = arith.constant 0 : i32
    return %c0_i32, %c0_i32_0, %c0_i32_1 : i32, i32, i32
  }
  func.func @transform_2(%arg0: i32, %arg1: i32) -> (i32, i32) {
    %c0_i32 = arith.constant 0 : i32
    %c0_i32_0 = arith.constant 0 : i32
    %c0_i32_1 = arith.constant 0 : i32
    return %c0_i32, %c0_i32_0 : i32, i32
  }
  func.func @transform_3(%arg0: i32, %arg1: i32) -> (i32, i32, i32) {
    %c0_i32 = arith.constant 0 : i32
    %c0_i32_0 = arith.constant 0 : i32
    %c0_i32_1 = arith.constant 0 : i32
    %c0_i32_2 = arith.constant 0 : i32
    return %c0_i32, %c0_i32_0, %c0_i32_1 : i32, i32, i32
  }
  func.func @transform_4(%arg0: i32, %arg1: i32) -> (i32, i32) {
    %c0_i32 = arith.constant 0 : i32
    %c0_i32_0 = arith.constant 0 : i32
    %c0_i32_1 = arith.constant 0 : i32
    return %c0_i32, %c0_i32_0 : i32, i32
  }
  func.func @transform_5(%arg0: i32, %arg1: i32) -> (i32, i32) {
    %c0_i32 = arith.constant 0 : i32
    %c0_i32_0 = arith.constant 0 : i32
    %c0_i32_1 = arith.constant 0 : i32
    return %c0_i32, %c0_i32_0 : i32, i32
  }
  func.func @transform_6(%arg0: i32, %arg1: i32) -> (i32, i32) {
    %c0_i32 = arith.constant 0 : i32
    %c0_i32_0 = arith.constant 0 : i32
    %c0_i32_1 = arith.constant 0 : i32
    return %c0_i32, %c0_i32_0 : i32, i32
  }
  func.func @transform_7(%arg0: i32, %arg1: i32) -> (i32, i32, i32, i32) {
    %c0_i32 = arith.constant 0 : i32
    %c0_i32_0 = arith.constant 0 : i32
    %c0_i32_1 = arith.constant 0 : i32
    return %arg0, %arg1, %c0_i32, %c0_i32_0 : i32, i32, i32, i32
  }
}

</mosaic_0001>

<bundles_post_ra>
// kernel: tpu_custom_call.1
= control target key start
LH: loop header
LB: loop body
LE: loop exit
PB: predicated region body
PF: predicated region fallthrough
CT: control target
= control target key end

     0   :  { %12 = vsyncpa [#allocation3], 0  ;;  %s4207_s0 = inlined_call_operand.vmem [shape: f32[4,12,16,12], index: 0, kind: input, shape index: {}]   ;;  %s4208_s1 = inlined_call_operand.vmem [shape: bf16[3,12,128], index: 1, kind: input, shape index: {}]   ;;  %s4209_s2 = inlined_call_operand.vmem [shape: f32[1,128], index: 2, kind: input, shape index: {}]   ;;  %s4210_s3 = inlined_call_operand.vmem [shape: bf16[3,384,128], index: 3, kind: input, shape index: {}]   ;;  %s4211_s4 = inlined_call_operand.vmem [shape: f32[1,128], index: 4, kind: input, shape index: {}]   ;;  %s4212_s5 = inlined_call_operand.vmem [shape: bf16[4,128], index: 5, kind: input, shape index: {}]   ;;  %s4213_s6 = inlined_call_operand.vmem [shape: f32[1,128], index: 6, kind: input, shape index: {}]   ;;  %s4214_s7 = inlined_call_operand.hbm [shape: f32[2,16,16,128], index: 7, kind: output, shape index: {}]  }
   0x1   :  { %14 = vsyncpa [#allocation3 + $0x1], 0  ;;  %s3216_s24 = smov 0   ;;  %s3218_s25 = smov 0  }
   0x2   :  { %s3220_s26 = smov 0   ;;  %s3222_s27 = smov 0  }
   0x3   :  { %s3224_s28 = smov 0   ;;  %s3226_s29 = smov 0  }
   0x4   :  { %s3228_s30 = smov 0   ;;  %s3230_s8 = smov 0  }
   0x5 LB: > { %s2442_s9 = sadd.s32 4294967295, %s3171_s8   ;;  %s2443_s10 = sadd.s32 4294967294, %s3171_s8   ;;  %s3171_s8 = sphi %s3230_s8, %s20_s8   ;;  %s3167_s30 = sphi %s3228_s30, %s4225_s30   ;;  %s3163_s29 = sphi %s3226_s29, %s4224_s29   ;;  %s3159_s28 = sphi %s3224_s28, %s4223_s28   ;;  %s3155_s27 = sphi %s3222_s27, %s4222_s27   ;;  %s3151_s26 = sphi %s3220_s26, %s4221_s26   ;;  %s3147_s25 = sphi %s3218_s25, %s4220_s25   ;;  %s3143_s24 = sphi %s3216_s24, %s4219_s24  }
   0x6   : > { %s29_s11 = sadd.s32 1, %s3163_s29  ;;  %s32_s12 = sadd.s32 1, %s3167_s30 }
   0x7   : > { %p30_p0 = scmp.ge.s32.totalorder %s29_s11, 2  ;;  %p207_p1 = scmp.ne.s32.totalorder %s3151_s26, %s3147_s25 }
   0x8   : > { %p208_p2 = scmp.eq.s32.totalorder %s2442_s9, 3  ;;  %p213_p5 = scmp.ne.s32.totalorder %s3147_s25, %s3143_s24 }
   0x9   : > { %s4227_s11 = smov (%p30_p0, %s29_s11), 0  ;;  %s4229_s12 = smov (!%p30_p0, %s32_s12), %s3167_s30 }
   0xa   : > { %s193_s13 = ssub.s32 %s3163_s29, %s4227_s11  ;;  %p3267_p3 = por %p208_p2, %p207_p1 }
   0xb   : > { %p34_p4 = scmp.ge.s32.totalorder %s4229_s12, 2  ;;  %p214_p6 = scmp.eq.s32.totalorder %s2443_s10, 3 }
   0xc   : > { %p2448_p7 = scmp.ge.s32.totalorder %s3171_s8, 1  ;;  %p262_p9 = scmp.lt.s32.totalorder %s3171_s8, 5 }
   0xd   : > { %s4231_s12 = smov (%p34_p4, %s4229_s12), 0  ;;  %p3276_p8 = por %p214_p6, %p213_p5 }
   0xe   : > { %s192_s16 = ssub.s32 %s3167_s30, %s4231_s12  ;;  %s197_s17 = sadd.s32 1, %s3151_s26 }
   0xf   : > { %s194_s18 = sor.u32 %s193_s13, %s192_s16  ;;  %p263_p10 = pnand %p2448_p7, %p262_p9 }
  0x10   : > { %p195_p11 = scmp.eq.s32.totalorder %s194_s18, 0  ;;  %s2450_s9 = sshll.u32 (!%p263_p10), %s3159_s28, 1 }
  0x11   : > { %266 = sbr.rel (%p263_p10) target bundleno = 888 (0x378), region = 48  ;;  %s297_s10 = sadd.s32 (!%p263_p10), %s3155_s27, %s2450_s9 }
  0x12   : > { %s3285_s19 = scalar_select %p195_p11, %s3151_s26, %s197_s17  }
  0x13   : > { %p298_p12 = scmp.lt.s32.totalorder (!%p263_p10), %s297_s10, 3  ;;  %p726_p13 = scmp.gt.s32.totalorder (!%p263_p10), %s3155_s27, 0 }
  0x14   : > { %p730_p0 = scmp.lt.s32.totalorder (!%p263_p10), %s3155_s27, 1  ;;  %s2972_s22 = sshll.u32 (!%p263_p10), %s3155_s27, 4 }
  0x15   : > { %s2893_s23 = sshll.u32 (!%p263_p10), %s3159_s28, 5  ;;  %s3097_s27 = scalar_lea.hbm (!%p263_p10), %s4214_s7, 512 }
  0x16   : > { %v2456_v0 = vld [vmem:[%s4208_s1 + $0x8] sm:$0xf]  ;;  %v2898_v1 = vld [vmem:[%s4208_s1 + $0x8] sm:$0x30]  ;;  %vm446_vm0 = vcmask 1045504   ;;  %s4233_s10 = smov (!%p298_p12, %s297_s10), 3 }
  0x17   : > { %v2457_v2 = vor.u32 %v2898_v1, %v2456_v0  ;;  %v2486_v3 = vld [vmem:[%s4208_s1 + $0x10] sm:$0xf]  ;;  %v2899_v4 = vld [vmem:[%s4208_s1 + $0x10] sm:$0x30]  ;;  %v2470_v6 = vld [vmem:[%s4208_s1] sm:$0xf] }
  0x18   : > { %v2487_v5 = vor.u32 %v2899_v4, %v2486_v3  ;;  %v2897_v7 = vld [vmem:[%s4208_s1] sm:$0x30]  ;;  %s2983_s9 = smul.u32 192, %s4233_s10  ;;  %vm415_vm1 = vcmask 97280   ;;  %vm914_vm3 = vcmask 1040384   ;;  %vm1058_vm6 = vcmask 1046528  }
  0x19   : > { %v448_v8 = vsel %vm446_vm0, %v2457_v2, 0  ;;  %v2471_v9 = vor.u32 %v2897_v7, %v2470_v6  ;;  %s727_s18 = scalar_select %p726_p13, 1, 0  ;;  %vm915_vm4 = vsmask.f32 256  ;;  %vm2246_vm9 = vcmask 1041408  }
  0x1a   : > { %2973 = vmatpush.bf16.msra.mxu1 %v448_v8  ;;  %2974 = vmatpush.bf16.msra.mxu2 %v448_v8  ;;  %v601_v10 = vsel %vm446_vm0, %v2487_v5, 0  ;;  %s3313_s17 = scalar_lea.vmem %s4207_s0, %s2983_s9  ;;  %vm3479_vm5 = vmand %vm914_vm3, %vm915_vm4  ;;  %vm937_vm7 = vsmask.f32 7424  ;;  %vm2221_vm10 = vcmask 31744  }
  0x1b   : > { %v523_v11 = vsel %vm446_vm0, %v2471_v9, 0  ;;  %457 = vmatpush.bf16.msra.mxu0 %v448_v8  ;;  %v323_v12 = vld [vmem:[%s3313_s17 + $0x80] sm:$0xff]  ;;  %v324_v13 = vld [vmem:[%s3313_s17 + $0x88] sm:$0xff]  ;;  %v325_v14 = vld [vmem:[%s3313_s17 + $0x90] sm:$0xff]  ;;  %s731_s9 = scalar_select %p730_p0, 1, 0 }
  0x1c   : > { %v347_v15 = vpack.c.bf16 %v323_v12, %v323_v12  ;;  %v348_v16 = vpack.c.bf16 %v324_v13, %v324_v13  ;;  %v326_v17 = vld [vmem:[%s3313_s17 + $0x98] sm:$0xff]  ;;  %v349_v18 = vpack.c.bf16 %v325_v14, %v325_v14  ;;  %v309_v20 = vld [vmem:[%s3313_s17 + $0x10] sm:$0xff]  ;;  %v307_v32 = vld [vmem:[%s3313_s17] sm:$0xff] }
  0x1d   : > { %v350_v19 = vpack.c.bf16 %v326_v17, %v326_v17  ;;  %v310_v24 = vld [vmem:[%s3313_s17 + $0x18] sm:$0xff]  ;;  %v333_v27 = vpack.c.bf16 %v309_v20, %v309_v20  ;;  %v308_v33 = vld [vmem:[%s3313_s17 + $0x8] sm:$0xff]  ;;  %v327_v34 = vld [vmem:[%s3313_s17 + $0xa0] sm:$0xff]  ;;  %v331_v37 = vpack.c.bf16 %v307_v32, %v307_v32 }
  0x1e   : > { %610 = vmatpush.bf16.msrb.mxu2 %v601_v10  ;;  %532 = vmatpush.bf16.msrb.mxu1 %v523_v11  ;;  %v394_v21 = vunpack.c.l.b16 %v347_v15  ;;  %v395_v22 = vunpack.c.l.b16 %v348_v16  ;;  %v396_v23 = vunpack.c.l.b16 %v349_v18  ;;  %v334_v28 = vpack.c.bf16 %v310_v24, %v310_v24  ;;  %v328_v35 = vld [vmem:[%s3313_s17 + $0xa8] sm:$0xff]  ;;  %v311_v41 = vld [vmem:[%s3313_s17 + $0x20] sm:$0xff]  ;;  %v313_v54 = vld [vmem:[%s3313_s17 + $0x30] sm:$0xff] }
  0x1f   : > { %v397_v25 = vunpack.c.l.b16 %v350_v19  ;;  %v380_v30 = vunpack.c.l.b16 %v333_v27  ;;  %v332_v38 = vpack.c.bf16 %v308_v33, %v308_v33  ;;  %v351_v39 = vpack.c.bf16 %v327_v34, %v327_v34  ;;  %v312_v42 = vld [vmem:[%s3313_s17 + $0x28] sm:$0xff]  ;;  %v314_v55 = vld [vmem:[%s3313_s17 + $0x38] sm:$0xff]  ;;  %v315_v61 = vld [vmem:[%s3313_s17 + $0x40] sm:$0xff] }
  0x20   : > { %v3321_v26 = vpack.c.b16 %v395_v22, %v394_v21  ;;  %v381_v31 = vunpack.c.l.b16 %v334_v28  ;;  %v352_v40 = vpack.c.bf16 %v328_v35, %v328_v35  ;;  %v511_v43 = vunpack.c.l.b16 %v331_v37  ;;  %v316_v62 = vld [vmem:[%s3313_s17 + $0x48] sm:$0xff]  ;;  %v317_v4 = vld [vmem:[%s3313_s17 + $0x50] sm:$0xff]  ;;  %v318_v5 = vld [vmem:[%s3313_s17 + $0x58] sm:$0xff] }
  0x21   : > { %v3323_v29 = vpack.c.b16 %v397_v25, %v396_v23  ;;  %v512_v44 = vunpack.c.l.b16 %v332_v38  ;;  %v398_v45 = vunpack.c.l.b16 %v351_v39  ;;  %v335_v47 = vpack.c.bf16 %v311_v41, %v311_v41  ;;  %v319_v11 = vld [vmem:[%s3313_s17 + $0x60] sm:$0xff]  ;;  %v320_v12 = vld [vmem:[%s3313_s17 + $0x68] sm:$0xff]  ;;  %v321_v18 = vld [vmem:[%s3313_s17 + $0x70] sm:$0xff] }
  0x22   : > { %2465 = vmatmul.msk.bf16.vlgmr.msra.gmra.mxu1 %vm415_vm1, %v3321_v26  ;;  %v400_v36 = vpack.c.b16 %v381_v31, %v380_v30  ;;  %v399_v46 = vunpack.c.l.b16 %v352_v40  ;;  %v336_v48 = vpack.c.bf16 %v312_v42, %v312_v42  ;;  %v337_v56 = vpack.c.bf16 %v313_v54, %v313_v54  ;;  %v322_v19 = vld [vmem:[%s3313_s17 + $0x78] sm:$0xff]  ;;  %v2906_v30 = vld [vmem:[%s4210_s3 + $0x30] sm:$0xff]  ;;  %v2905_v34 = vld [vmem:[%s4210_s3 + $0x28] sm:$0xff] }
  0x23   : > { %2466 = vmatmul.msk.bf16.vlgmr.msra.gmra.mxu2 %vm415_vm1, %v3323_v29  ;;  %v513_v49 = vpack.c.b16 %v512_v44, %v511_v43  ;;  %v382_v51 = vunpack.c.l.b16 %v335_v47  ;;  %v338_v57 = vpack.c.bf16 %v314_v55, %v314_v55  ;;  %v339_v63 = vpack.c.bf16 %v315_v61, %v315_v61  ;;  %v2907_v27 = vld [vmem:[%s4210_s3 + $0x38] sm:$0xff]  ;;  %v2914_v35 = vld [vmem:[%s4210_s3 + $0x70] sm:$0xff]  ;;  %v2904_v37 = vld [vmem:[%s4210_s3 + $0x20] sm:$0xff] }
  0x24   : > { %2458 = vmatmul.msk.bf16.vlgmr.msra.gmra.mxu0 %vm415_vm1, %v400_v36  ;;  %v3336_v50 = vpack.c.b16 %v399_v46, %v398_v45  ;;  %v383_v52 = vunpack.c.l.b16 %v336_v48  ;;  %v384_v58 = vunpack.c.l.b16 %v337_v56  ;;  %v340_v0 = vpack.c.bf16 %v316_v62, %v316_v62  ;;  %1642 = vmatpush.bf16.msra.mxu1 %v2907_v27  ;;  %v2915_v33 = vld [vmem:[%s4210_s3 + $0x78] sm:$0xff]  ;;  %v2913_v40 = vld [vmem:[%s4210_s3 + $0x68] sm:$0xff]  ;;  %v2930_v43 = vld [vmem:[%s4210_s3 + $0xf0] sm:$0xff] }
  0x25   : > { %v385_v59 = vunpack.c.l.b16 %v338_v57  ;;  %v386_v1 = vunpack.c.l.b16 %v339_v63  ;;  %v341_v6 = vpack.c.bf16 %v317_v4, %v317_v4  ;;  %v342_v7 = vpack.c.bf16 %v318_v5, %v318_v5  ;;  %1691 = vmatpush.bf16.msra.mxu2 %v2915_v33  ;;  %v2931_v39 = vld [vmem:[%s4210_s3 + $0xf8] sm:$0xff]  ;;  %v2902_v45 = vld [vmem:[%s4210_s3 + $0x10] sm:$0xff]  ;;  %v2929_v47 = vld [vmem:[%s4210_s3 + $0xe8] sm:$0xff] }
  0x26   : > { %v401_v53 = vpack.c.b16 %v383_v52, %v382_v51  ;;  %v387_v2 = vunpack.c.l.b16 %v340_v0  ;;  %v343_v13 = vpack.c.bf16 %v319_v11, %v319_v11  ;;  %v344_v14 = vpack.c.bf16 %v320_v12, %v320_v12  ;;  %v2903_v42 = vld [vmem:[%s4210_s3 + $0x18] sm:$0xff]  ;;  %1351 = vmatpush.bf16.msrb.mxu0 %v2931_v39  ;;  %2975 = vmatpush.bf16.msra.mxu3 %v2931_v39  ;;  %v2928_v52 = vld [vmem:[%s4210_s3 + $0xe0] sm:$0xff]  ;;  %v2926_v63 = vld [vmem:[%s4210_s3 + $0xd0] sm:$0xff] }
  0x27   : > { %v402_v60 = vpack.c.b16 %v385_v59, %v384_v58  ;;  %v388_v8 = vunpack.c.l.b16 %v341_v6  ;;  %v389_v9 = vunpack.c.l.b16 %v342_v7  ;;  %v345_v20 = vpack.c.bf16 %v321_v18, %v321_v18  ;;  %v2911_v48 = vld [vmem:[%s4210_s3 + $0x58] sm:$0xff]  ;;  %v2900_v55 = vld [vmem:[%s4210_s3] sm:$0xff]  ;;  %v2909_v58 = vld [vmem:[%s4210_s3 + $0x48] sm:$0xff] }
  0x28   : > { %v403_v3 = vpack.c.b16 %v387_v2, %v386_v1  ;;  %v390_v15 = vunpack.c.l.b16 %v343_v13  ;;  %v391_v16 = vunpack.c.l.b16 %v344_v14  ;;  %v346_v21 = vpack.c.bf16 %v322_v19, %v322_v19  ;;  %1643 = vmatpush.bf16.msra.mxu1 %v2906_v30  ;;  %v2927_v57 = vld [vmem:[%s4210_s3 + $0xd8] sm:$0xff]  ;;  %v3460_v62 = vld [vmem:[%s4209_s2] ss:$0 sm:$0xff]  ;;  %v2925_v6 = vld [vmem:[%s4210_s3 + $0xc8] sm:$0xff] }
  0x29   : > { %v404_v10 = vpack.c.b16 %v389_v9, %v388_v8  ;;  %v392_v22 = vunpack.c.l.b16 %v345_v20  ;;  %1692 = vmatpush.bf16.msra.mxu2 %v2914_v35  ;;  %v330_v61 = vld [vmem:[%s3313_s17 + $0xb8] sm:$0xff]  ;;  %v728_v7 = vstv %s727_s18  ;;  %v2924_v13 = vld [vmem:[%s4210_s3 + $0xc0] sm:$0xff]  ;;  %s293_s18 = sand.u32 1, %s3147_s25  }
  0x2a   : > { %v405_v17 = vpack.c.b16 %v391_v16, %v390_v15  ;;  %v393_v23 = vunpack.c.l.b16 %v346_v21  ;;  %1352 = vmatpush.bf16.msrb.mxu0 %v2930_v43  ;;  %2976 = vmatpush.bf16.msra.mxu3 %v2930_v43  ;;  %v354_v4 = vpack.c.bf16 %v330_v61, %v330_v61  ;;  %vm729_vm2 = vcmp.eq.s32.totalorder %v728_v7, 1  ;;  %s2449_s20 = sshll.u32 %s293_s18, 7 }
  0x2b   : > { %s4099_s21 = scalar_lea.vmem [#allocation2], %s2449_s20  ;;  %s2348_s20 = scalar_lea.sflag [#allocation3], %s293_s18 }
  0x2c   : > { %v406_v24 = vpack.c.b16 %v393_v23, %v392_v22  ;;  %1644 = vmatpush.bf16.msra.mxu1 %v2905_v34  ;;  %v590_v9 = vunpack.c.l.b16 %v354_v4  ;;  %s2363_s16 = sshll.u32 %s4099_s21, 4  ;;  %s2364_s16 = int_to_ptr.vmem [resolvable:$true] %s2363_s16 }
  0x2d   : > { %1693 = vmatpush.bf16.msra.mxu2 %v2913_v40 }
  0x2e   : > { %1353 = vmatpush.bf16.msrb.mxu0 %v2929_v47  ;;  %2977 = vmatpush.bf16.msra.mxu3 %v2929_v47 }
  0x30   : > { %1645 = vmatpush.bf16.msra.mxu1 %v2904_v37 }
  0x32   : > { %2472 = vmatmul.msk.bf16.vlgmr.msrb.gmra.mxu1 %vm415_vm1, %v513_v49  ;;  %v2901_v49 = vld [vmem:[%s4210_s3 + $0x8] sm:$0xff]  ;;  %1354 = vmatpush.bf16.msrb.mxu0 %v2928_v52 }
  0x33   : > { %2467 = vmatmul.msk.bf16.gmra.mxu2 %vm415_vm1, %v3336_v50  ;;  %2978 = vmatpush.bf16.msra.mxu3 %v2928_v52 }
  0x34   : > { %2459 = vmatmul.msk.bf16.gmra.mxu0 %vm415_vm1, %v401_v53  ;;  %1646 = vmatpush.bf16.msra.mxu1 %v2903_v42 }
  0x36   : > { %1355 = vmatpush.bf16.msrb.mxu0 %v2927_v57 }
  0x37   : > { %2979 = vmatpush.bf16.msra.mxu3 %v2927_v57 }
  0x38   : > { %1647 = vmatpush.bf16.msra.mxu1 %v2902_v45 }
  0x3a   : > { %1356 = vmatpush.bf16.msrb.mxu0 %v2926_v63 }
  0x3b   : > { %2980 = vmatpush.bf16.msra.mxu3 %v2926_v63 }
  0x3c   : > { %1648 = vmatpush.bf16.msra.mxu1 %v2901_v49 }
  0x3e   : > { %1357 = vmatpush.bf16.msrb.mxu0 %v2925_v6 }
  0x3f   : > { %2981 = vmatpush.bf16.msra.mxu3 %v2925_v6 }
  0x40   : > { %1649 = vmatpush.bf16.msra.mxu1 %v2900_v55 }
  0x42   : > { %2473 = vmatmul.msk.bf16.gmra.mxu1 %vm415_vm1, %v400_v36  ;;  %1358 = vmatpush.bf16.msrb.mxu0 %v2924_v13 }
  0x43   : > { %2488 = vmatmul.msk.bf16.vlgmr.msrb.gmra.mxu2 %vm415_vm1, %v401_v53  ;;  %2982 = vmatpush.bf16.msra.mxu3 %v2924_v13 }
  0x44   : > { %2460 = vmatmul.msk.bf16.gmra.mxu0 %vm415_vm1, %v402_v60 }
  0x52   : > { %2474 = vmatmul.msk.bf16.gmra.mxu1 %vm415_vm1, %v401_v53  ;;  %v2910_v53 = vld [vmem:[%s4210_s3 + $0x50] sm:$0xff] }
  0x53   : > { %2489 = vmatmul.msk.bf16.gmra.mxu2 %vm415_vm1, %v402_v60 }
  0x54   : > { %2461 = vmatmul.msk.bf16.gmra.mxu0 %vm415_vm1, %v403_v3 }
  0x62   : > { %2475 = vmatmul.msk.bf16.gmra.mxu1 %vm415_vm1, %v402_v60  ;;  %v329_v60 = vld [vmem:[%s3313_s17 + $0xb0] sm:$0xff] }
  0x63   : > { %2490 = vmatmul.msk.bf16.gmra.mxu2 %vm415_vm1, %v403_v3 }
  0x64   : > { %2462 = vmatmul.msk.bf16.gmra.mxu0 %vm415_vm1, %v404_v10 }
  0x72   : > { %2476 = vmatmul.msk.bf16.gmra.mxu1 %vm415_vm1, %v403_v3  ;;  %v353_v3 = vpack.c.bf16 %v329_v60, %v329_v60 }
  0x73   : > { %2491 = vmatmul.msk.bf16.gmra.mxu2 %vm415_vm1, %v404_v10 }
  0x74   : > { %2463 = vmatmul.msk.bf16.gmra.mxu0 %vm415_vm1, %v405_v17  ;;  %v589_v8 = vunpack.c.l.b16 %v353_v3 }
  0x76   : > { %v591_v16 = vpack.c.b16 %v590_v9, %v589_v8 }
  0x82   : > { %2477 = vmatmul.msk.bf16.gmra.mxu1 %vm415_vm1, %v404_v10 }
  0x83   : > { %2492 = vmatmul.msk.bf16.gmra.mxu2 %vm415_vm1, %v405_v17 }
  0x84   : > { %2464 = vmatmul.msk.bf16.gmra.mxu0 %vm415_vm1, %v406_v24 }
  0x92   : > { %2478 = vmatmul.msk.bf16.gmra.mxu1 %vm415_vm1, %v405_v17 }
  0x93   : > { %2493 = vmatmul.msk.bf16.gmra.mxu2 %vm415_vm1, %v406_v24 }
  0x9f   : > { %v3369_v25 = vpop.f32.mrf.mxu1 }
  0xa1   : > { %v459_v32 = vpop.f32.mrf.mxu0 }
  0xa2   : > { %2479 = vmatmul.msk.bf16.gmra.mxu1 %vm415_vm1, %v406_v24 }
  0xa3   : > { %2494 = vmatmul.msk.bf16.gmra.mxu2 %vm415_vm1, %v3321_v26 }
  0xa6   : > { %v3377_v28 = vpop.f32.mrf.mxu2 }
  0xa7   : > { %v3382_v31 = vpop.f32.mrf.mxu1 }
  0xa9   : > { %v3406_v41 = vpop.f32.mrf.mxu0 }
  0xae   : > { %v3393_v36 = vpop.f32.mrf.mxu2 }
  0xaf   : > { %v534_v38 = vpop.f32.mrf.mxu1 }
  0xb0   : > { %v535_v59 = vadd.f32 %v534_v38, %v459_v32 }
  0xb1   : > { %v464_v51 = vpop.f32.mrf.mxu0 }
  0xb2   : > { %2480 = vmatmul.msk.bf16.gmra.mxu1 %vm415_vm1, %v3321_v26  ;;  %v2912_v26 = vld [vmem:[%s4210_s3 + $0x60] sm:$0xff] }
  0xb3   : > { %2495 = vmatmul.msk.bf16.gmra.mxu2 %vm415_vm1, %v3323_v29 }
  0xb4   : > { %1694 = vmatpush.bf16.msra.mxu2 %v2912_v26 }
  0xb6   : > { %v3419_v44 = vpop.f32.mrf.mxu2 }
  0xb7   : > { %v536_v46 = vpop.f32.mrf.mxu1 }
  0xb8   : > { %1695 = vmatpush.bf16.msra.mxu2 %v2911_v48  ;;  %v537_v10 = vadd.f32 %v536_v46, %v3406_v41 }
  0xb9   : > { %v466_v0 = vpop.f32.mrf.mxu0 }
  0xbc   : > { %1696 = vmatpush.bf16.msra.mxu2 %v2910_v53 }
  0xbe   : > { %v3439_v54 = vpop.f32.mrf.mxu2 }
  0xbf   : > { %v539_v56 = vpop.f32.mrf.mxu1 }
  0xc0   : > { %1697 = vmatpush.bf16.msra.mxu2 %v2909_v58  ;;  %v540_v20 = vadd.f32 %v539_v56, %v464_v51 }
  0xc1   : > { %v469_v17 = vpop.f32.mrf.mxu0 }
  0xc2   : > { %2481 = vmatmul.msk.bf16.gmra.mxu1 %vm415_vm1, %v3323_v29  ;;  %v2908_v29 = vld [vmem:[%s4210_s3 + $0x40] sm:$0xff] }
  0xc3   : > { %2496 = vmatmul.msk.bf16.gmra.mxu2 %vm415_vm1, %v3336_v50 }
  0xc4   : > { %1698 = vmatpush.bf16.msra.mxu2 %v2908_v29 }
  0xc6   : > { %v612_v50 = vpop.f32.mrf.mxu2 }
  0xc7   : > { %v662_v1 = vadd.f32 %v612_v50, %v535_v59  ;;  %v541_v2 = vpop.f32.mrf.mxu1 }
  0xc8   : > { %v542_v40 = vadd.f32 %v541_v2, %v466_v0 }
  0xc9   : > { %v686_v5 = vadd.f32 %v3460_v62, %v662_v1  ;;  %v471_v38 = vpop.f32.mrf.mxu0 }
  0xcb   : > { %v706_v11 = vmax.f32 %v686_v5, 0.0 }
  0xcd   : > { %v734_v18 = vsel %vm729_vm2, %v706_v11, 0.0 }
  0xce   : > { %v614_v12 = vpop.f32.mrf.mxu2  ;;  %v754_v22 = vpack.c.bf16 %v734_v18, %v734_v18 }
  0xcf   : > { %v663_v14 = vadd.f32 %v614_v12, %v537_v10  ;;  %v544_v15 = vpop.f32.mrf.mxu1 }
  0xd0   : > { %v794_v33 = vunpack.c.l.b16 %v754_v22  ;;  %v545_v53 = vadd.f32 %v544_v15, %v469_v17 }
  0xd1   : > { %v687_v19 = vadd.f32 %v3460_v62, %v663_v14  ;;  %v474_v61 = vpop.f32.mrf.mxu0 }
  0xd3   : > { %v707_v21 = vmax.f32 %v687_v19, 0.0  ;;  %2497 = vmatmul.msk.bf16.gmra.mxu2 %vm415_vm1, %v591_v16 }
  0xd5   : > { %v735_v23 = vsel %vm729_vm2, %v707_v21, 0.0 }
  0xd6   : > { %v755_v24 = vpack.c.bf16 %v735_v23, %v735_v23  ;;  %v617_v27 = vpop.f32.mrf.mxu2 }
  0xd7   : > { %v664_v30 = vadd.f32 %v617_v27, %v540_v20  ;;  %v546_v32 = vpop.f32.mrf.mxu1 }
  0xd8   : > { %v795_v34 = vunpack.c.l.b16 %v755_v24  ;;  %v547_v13 = vadd.f32 %v546_v32, %v471_v38 }
  0xd9   : > { %v688_v37 = vadd.f32 %v3460_v62, %v664_v30  ;;  %v476_v16 = vpop.f32.mrf.mxu0 }
  0xda   : > { %v814_v35 = vpack.c.b16 %v795_v34, %v794_v33 }
  0xdb   : > { %v708_v42 = vmax.f32 %v688_v37, 0.0 }
  0xdc   : > { %v825_v39 = vshrl.u32 %v814_v35, 16  ;;  %v828_v45 = vshll.u32 %v814_v35, 16 }
  0xdd   : > { %v756_v52 = vpack.c.bf16 %v708_v42, %v708_v42 }
  0xde   : > { %v619_v43 = vpop.f32.mrf.mxu2  ;;  %v827_v26 = vrot.slane %v825_v39, 7 }
  0xdf   : > { %v665_v46 = vadd.f32 %v619_v43, %v542_v40  ;;  %v549_v47 = vpop.f32.mrf.mxu1  ;;  %v796_v1 = vunpack.c.l.b16 %v756_v52 }
  0xe0   : > { %v830_v48 = vor.u32 %v828_v45, %v827_v26  ;;  %v927_v49 = vsel %vm3479_vm5, %v827_v26, 0  ;;  %v550_v34 = vadd.f32 %v549_v47, %v474_v61 }
  0xe1   : > { %v689_v51 = vadd.f32 %v3460_v62, %v665_v46  ;;  %v946_v56 = vshll.u32 %v927_v49, 16  ;;  %v1060_v60 = vrot.slane %v927_v49, 1 }
  0xe2   : > { %v917_v55 = vsel %vm3479_vm5, 0, %v830_v48 }
  0xe3   : > { %v709_v57 = vmax.f32 %v689_v51, 0.0  ;;  %v941_v58 = vshll.u32 %v917_v55, 16  ;;  %v1059_v59 = vrot.slane %v917_v55, 1  ;;  %1650 = vmatmul.bf16.vlgmr.msra.gmra.mxu1 %v917_v55  ;;  %v939_v29 = vshrl.u32 %v917_v55, 16  ;;  %v479_v51 = vpop.f32.mrf.mxu0 }
  0xe4   : > { %v948_v7 = vrot.slane %v946_v56, 1 }
  0xe5   : > { %v757_v63 = vpack.c.bf16 %v709_v57, %v709_v57  ;;  %v943_v50 = vrot.slane %v941_v58, 1  ;;  %v3489_v0 = vsel %vm1058_vm6, %v1059_v59, %v1060_v60 }
  0xe6   : > { %v622_v2 = vpop.f32.mrf.mxu2 }
  0xe7   : > { %v797_v3 = vunpack.c.l.b16 %v757_v63  ;;  %v944_v4 = vor.u32 %v943_v50, %v939_v29  ;;  %v666_v5 = vadd.f32 %v622_v2, %v545_v53  ;;  %v551_v6 = vpop.f32.mrf.mxu1 }
  0xe8   : > { %v552_v58 = vadd.f32 %v551_v6, %v476_v16  ;;  %v2946_v16 = vld [vmem:[%s4210_s3 + $0x170] sm:$0xff] }
  0xe9   : > { %v815_v8 = vpack.c.b16 %v797_v3, %v796_v1  ;;  %v949_v9 = vsel %vm937_vm7, %v944_v4, %v948_v7  ;;  %v690_v11 = vadd.f32 %v3460_v62, %v666_v5  ;;  %v2947_v5 = vld [vmem:[%s4210_s3 + $0x178] sm:$0xff] }
  0xea   : > { %1699 = vmatmul.bf16.vlgmr.msra.gmra.mxu2 %v949_v9  ;;  %1449 = vmatpush.bf16.msra.mxu0 %v2947_v5 }
  0xeb   : > { %v832_v10 = vshrl.u32 %v815_v8, 16  ;;  %v835_v12 = vshll.u32 %v815_v8, 16  ;;  %v710_v17 = vmax.f32 %v690_v11, 0.0  ;;  %v481_v2 = vpop.f32.mrf.mxu0 }
  0xed   : > { %v834_v14 = vrot.slane %v832_v10, 7  ;;  %v758_v33 = vpack.c.bf16 %v710_v17, %v710_v17 }
  0xee   : > { %v624_v15 = vpop.f32.mrf.mxu2  ;;  %1450 = vmatpush.bf16.msra.mxu0 %v2946_v16 }
  0xef   : > { %v667_v18 = vadd.f32 %v624_v15, %v547_v13  ;;  %v837_v19 = vor.u32 %v835_v12, %v834_v14  ;;  %v928_v20 = vsel %vm3479_vm5, %v834_v14, 0  ;;  %v554_v21 = vpop.f32.mrf.mxu1  ;;  %v798_v45 = vunpack.c.l.b16 %v758_v33 }
  0xf0   : > { %v958_v27 = vshll.u32 %v928_v20, 16  ;;  %v1063_v30 = vrot.slane %v928_v20, 1  ;;  %v555_v7 = vadd.f32 %v554_v21, %v479_v51  ;;  %v2943_v51 = vld [vmem:[%s4210_s3 + $0x158] sm:$0xff] }
  0xf1   : > { %v691_v22 = vadd.f32 %v3460_v62, %v667_v18  ;;  %v918_v23 = vsel %vm3479_vm5, 0, %v837_v19 }
  0xf2   : > { %1359 = vmatmul.bf16.vlgmr.msrb.gmra.mxu0 %v918_v23  ;;  %v953_v24 = vshll.u32 %v918_v23, 16  ;;  %v1062_v32 = vrot.slane %v918_v23, 1  ;;  %v951_v37 = vshrl.u32 %v918_v23, 16  ;;  %v960_v26 = vrot.slane %v958_v27, 1 }
  0xf3   : > { %v711_v35 = vmax.f32 %v691_v22, 0.0  ;;  %1655 = vmatmul.bf16.gmra.mxu1 %v918_v23  ;;  %v2945_v22 = vld [vmem:[%s4210_s3 + $0x168] sm:$0xff]  ;;  %v484_v27 = vpop.f32.mrf.mxu0 }
  0xf4   : > { %v955_v38 = vrot.slane %v953_v24, 1  ;;  %v3499_v39 = vsel %vm1058_vm6, %v1062_v32, %v1063_v30  ;;  %1451 = vmatpush.bf16.msra.mxu0 %v2945_v22 }
  0xf5   : > { %v759_v40 = vpack.c.bf16 %v711_v35, %v711_v35 }
  0xf6   : > { %v627_v42 = vpop.f32.mrf.mxu2  ;;  %v956_v43 = vor.u32 %v955_v38, %v951_v37  ;;  %v2944_v37 = vld [vmem:[%s4210_s3 + $0x160] sm:$0xff] }
  0xf7   : > { %v799_v46 = vunpack.c.l.b16 %v759_v40  ;;  %v668_v48 = vadd.f32 %v627_v42, %v550_v34  ;;  %v556_v47 = vpop.f32.mrf.mxu1 }
  0xf8   : > { %v3502_v49 = vsel %vm937_vm7, %v956_v43, %v960_v26  ;;  %v557_v33 = vadd.f32 %v556_v47, %v481_v2  ;;  %1452 = vmatpush.bf16.msra.mxu0 %v2944_v37 }
  0xf9   : > { %v816_v52 = vpack.c.b16 %v799_v46, %v798_v45  ;;  %v692_v55 = vadd.f32 %v3460_v62, %v668_v48 }
  0xfa   : > { %1704 = vmatmul.bf16.gmra.mxu2 %v3502_v49 }
  0xfb   : > { %v839_v53 = vshrl.u32 %v816_v52, 16  ;;  %v842_v57 = vshll.u32 %v816_v52, 16  ;;  %v712_v60 = vmax.f32 %v692_v55, 0.0 }
  0xfc   : > { %1453 = vmatpush.bf16.msra.mxu0 %v2943_v51 }
  0xfd   : > { %v841_v56 = vrot.slane %v839_v53, 7  ;;  %v760_v6 = vpack.c.bf16 %v712_v60, %v712_v60 }
  0xfe   : > { %v629_v59 = vpop.f32.mrf.mxu2 }
  0xff   : > { %v669_v61 = vadd.f32 %v629_v59, %v552_v58  ;;  %v844_v63 = vor.u32 %v842_v57, %v841_v56  ;;  %v3508_v29 = vsel %vm3479_vm5, %v841_v56, 0  ;;  %v559_v9 = vpop.f32.mrf.mxu1  ;;  %v800_v17 = vunpack.c.l.b16 %v760_v6  ;;  %v486_v58 = vpop.f32.mrf.mxu0 }
 0x100   : > { %v970_v4 = vshll.u32 %v3508_v29, 16  ;;  %v560_v47 = vadd.f32 %v559_v9, %v484_v27 }
 0x101   : > { %v693_v50 = vadd.f32 %v3460_v62, %v669_v61  ;;  %v3513_v1 = vsel %vm3479_vm5, 0, %v844_v63  ;;  %v2942_v63 = vld [vmem:[%s4210_s3 + $0x150] sm:$0xff] }
 0x102   : > { %1364 = vmatmul.bf16.gmra.mxu0 %v3513_v1  ;;  %v965_v3 = vshll.u32 %v3513_v1, 16  ;;  %v963_v10 = vshrl.u32 %v3513_v1, 16  ;;  %v972_v15 = vrot.slane %v970_v4, 1 }
 0x103   : > { %v713_v8 = vmax.f32 %v693_v50, 0.0  ;;  %1660 = vmatmul.bf16.gmra.mxu1 %v3513_v1  ;;  %1454 = vmatpush.bf16.msra.mxu0 %v2942_v63 }
 0x104   : > { %v967_v11 = vrot.slane %v965_v3, 1 }
 0x105   : > { %v761_v12 = vpack.c.bf16 %v713_v8, %v713_v8 }
 0x106   : > { %v632_v13 = vpop.f32.mrf.mxu2  ;;  %v968_v14 = vor.u32 %v967_v11, %v963_v10 }
 0x107   : > { %v801_v18 = vunpack.c.l.b16 %v761_v12  ;;  %v670_v19 = vadd.f32 %v632_v13, %v555_v7  ;;  %v561_v34 = vpop.f32.mrf.mxu1  ;;  %v2941_v7 = vld [vmem:[%s4210_s3 + $0x148] sm:$0xff] }
 0x108   : > { %v3527_v20 = vsel %vm937_vm7, %v968_v14, %v972_v15  ;;  %1455 = vmatpush.bf16.msra.mxu0 %v2941_v7  ;;  %v562_v12 = vadd.f32 %v561_v34, %v486_v58  ;;  %v2940_v14 = vld [vmem:[%s4210_s3 + $0x140] sm:$0xff]  ;;  %v2963_v34 = vld [vmem:[%s4210_s3 + $0x1f8] sm:$0xff] }
 0x109   : > { %v817_v21 = vpack.c.b16 %v801_v18, %v800_v17  ;;  %v694_v24 = vadd.f32 %v3460_v62, %v670_v19  ;;  %v489_v19 = vpop.f32.mrf.mxu0  ;;  %2050 = vmatpush.bf16.msrb.mxu1 %v2963_v34 }
 0x10a   : > { %1709 = vmatmul.bf16.gmra.mxu2 %v3527_v20 }
 0x10b   : > { %v846_v23 = vshrl.u32 %v817_v21, 16  ;;  %v849_v32 = vshll.u32 %v817_v21, 16  ;;  %v714_v38 = vmax.f32 %v694_v24, 0.0 }
 0x10c   : > { %1456 = vmatpush.bf16.msra.mxu0 %v2940_v14 }
 0x10d   : > { %v848_v30 = vrot.slane %v846_v23, 7  ;;  %v762_v52 = vpack.c.bf16 %v714_v38, %v714_v38 }
 0x10e   : > { %v634_v35 = vpop.f32.mrf.mxu2 }
 0x10f   : > { %v671_v40 = vadd.f32 %v634_v35, %v557_v33  ;;  %v851_v42 = vor.u32 %v849_v32, %v848_v30  ;;  %v3539_v43 = vsel %vm3479_vm5, %v848_v30, 0  ;;  %v802_v50 = vunpack.c.l.b16 %v762_v52  ;;  %v564_v4 = vpop.f32.mrf.mxu1  ;;  %v2962_v52 = vld [vmem:[%s4210_s3 + $0x1f0] sm:$0xff] }
 0x110   : > { %v982_v48 = vshll.u32 %v3539_v43, 16  ;;  %v565_v32 = vadd.f32 %v564_v4, %v489_v19  ;;  %2051 = vmatpush.bf16.msrb.mxu1 %v2962_v52  ;;  %v2970_v4 = vld [vmem:[%s4210_s3 + $0x230] sm:$0xff] }
 0x111   : > { %v695_v26 = vadd.f32 %v3460_v62, %v671_v40  ;;  %v3544_v45 = vsel %vm3479_vm5, 0, %v851_v42 }
 0x112   : > { %1369 = vmatmul.bf16.gmra.mxu0 %v3544_v45  ;;  %v977_v46 = vshll.u32 %v3544_v45, 16  ;;  %v975_v55 = vshrl.u32 %v3544_v45, 16  ;;  %v984_v61 = vrot.slane %v982_v48, 1 }
 0x113   : > { %v715_v53 = vmax.f32 %v695_v26, 0.0  ;;  %1665 = vmatmul.bf16.gmra.mxu1 %v3544_v45 }
 0x114   : > { %v979_v56 = vrot.slane %v977_v46, 1 }
 0x115   : > { %v763_v57 = vpack.c.bf16 %v715_v53, %v715_v53 }
 0x116   : > { %v637_v59 = vpop.f32.mrf.mxu2  ;;  %v980_v60 = vor.u32 %v979_v56, %v975_v55  ;;  %v491_v55 = vpop.f32.mrf.mxu0  ;;  %v2971_v56 = vld [vmem:[%s4210_s3 + $0x238] sm:$0xff] }
 0x117   : > { %v803_v2 = vunpack.c.l.b16 %v763_v57  ;;  %v672_v3 = vadd.f32 %v637_v59, %v560_v47  ;;  %v566_v23 = vpop.f32.mrf.mxu1  ;;  %v2961_v59 = vld [vmem:[%s4210_s3 + $0x1e8] sm:$0xff]  ;;  %2099 = vmatpush.bf16.msrb.mxu2 %v2971_v56  ;;  %v2936_v56 = vld [vmem:[%s4210_s3 + $0x120] sm:$0xff] }
 0x118   : > { %v3558_v5 = vsel %vm937_vm7, %v980_v60, %v984_v61  ;;  %2052 = vmatpush.bf16.msrb.mxu1 %v2961_v59 }
 0x119   : > { %v818_v6 = vpack.c.b16 %v803_v2, %v802_v50  ;;  %v696_v9 = vadd.f32 %v3460_v62, %v672_v3  ;;  %v567_v50 = vadd.f32 %v566_v23, %v491_v55  ;;  %v2939_v2 = vld [vmem:[%s4210_s3 + $0x138] sm:$0xff]  ;;  %v2957_v55 = vld [vmem:[%s4210_s3 + $0x1c8] sm:$0xff] }
 0x11a   : > { %1714 = vmatmul.bf16.gmra.mxu2 %v3558_v5  ;;  %1400 = vmatpush.bf16.msrb.mxu3 %v2939_v2 }
 0x11b   : > { %v853_v8 = vshrl.u32 %v818_v6, 16  ;;  %v856_v11 = vshll.u32 %v818_v6, 16  ;;  %v716_v15 = vmax.f32 %v696_v9, 0.0  ;;  %2100 = vmatpush.bf16.msrb.mxu2 %v2970_v4  ;;  %v2956_v4 = vld [vmem:[%s4210_s3 + $0x1c0] sm:$0xff] }
 0x11d   : > { %v855_v10 = vrot.slane %v853_v8, 7  ;;  %v764_v30 = vpack.c.bf16 %v716_v15, %v716_v15 }
 0x11e   : > { %v639_v13 = vpop.f32.mrf.mxu2 }
 0x11f   : > { %v673_v16 = vadd.f32 %v639_v13, %v562_v12  ;;  %v858_v17 = vor.u32 %v856_v11, %v855_v10  ;;  %v3570_v18 = vsel %vm3479_vm5, %v855_v10, 0  ;;  %v804_v46 = vunpack.c.l.b16 %v764_v30  ;;  %v569_v60 = vpop.f32.mrf.mxu1  ;;  %v2938_v10 = vld [vmem:[%s4210_s3 + $0x130] sm:$0xff]  ;;  %v2960_v11 = vld [vmem:[%s4210_s3 + $0x1e0] sm:$0xff] }
 0x120   : > { %v994_v27 = vshll.u32 %v3570_v18, 16  ;;  %2053 = vmatpush.bf16.msrb.mxu1 %v2960_v11  ;;  %1401 = vmatpush.bf16.msrb.mxu3 %v2938_v10 }
 0x121   : > { %v697_v21 = vadd.f32 %v3460_v62, %v673_v16  ;;  %v3575_v22 = vsel %vm3479_vm5, 0, %v858_v17  ;;  %v2969_v16 = vld [vmem:[%s4210_s3 + $0x228] sm:$0xff] }
 0x122   : > { %1374 = vmatmul.bf16.gmra.mxu0 %v3575_v22  ;;  %v989_v24 = vshll.u32 %v3575_v22, 16  ;;  %v987_v35 = vshrl.u32 %v3575_v22, 16  ;;  %v996_v26 = vrot.slane %v994_v27, 1  ;;  %2101 = vmatpush.bf16.msrb.mxu2 %v2969_v16  ;;  %v570_v27 = vadd.f32 %v569_v60, %v3369_v25 }
 0x123   : > { %v717_v33 = vmax.f32 %v697_v21, 0.0  ;;  %1670 = vmatmul.bf16.gmra.mxu1 %v3575_v22  ;;  %v2959_v21 = vld [vmem:[%s4210_s3 + $0x1d8] sm:$0xff] }
 0x124   : > { %v991_v37 = vrot.slane %v989_v24, 1  ;;  %2054 = vmatpush.bf16.msrb.mxu1 %v2959_v21 }
 0x125   : > { %v765_v38 = vpack.c.bf16 %v717_v33, %v717_v33 }
 0x126   : > { %v642_v40 = vpop.f32.mrf.mxu2  ;;  %v992_v42 = vor.u32 %v991_v37, %v987_v35  ;;  %v2968_v37 = vld [vmem:[%s4210_s3 + $0x220] sm:$0xff] }
 0x127   : > { %v805_v48 = vunpack.c.l.b16 %v765_v38  ;;  %v674_v51 = vadd.f32 %v642_v40, %v565_v32  ;;  %v571_v32 = vpop.f32.mrf.mxu1  ;;  %2102 = vmatpush.bf16.msrb.mxu2 %v2968_v37 }
 0x128   : > { %v3589_v47 = vsel %vm937_vm7, %v992_v42, %v996_v26  ;;  %v2958_v26 = vld [vmem:[%s4210_s3 + $0x1d0] sm:$0xff] }
 0x129   : > { %v819_v53 = vpack.c.b16 %v805_v48, %v804_v46  ;;  %v698_v58 = vadd.f32 %v3460_v62, %v674_v51  ;;  %2055 = vmatpush.bf16.msrb.mxu1 %v2958_v26  ;;  %v2937_v48 = vld [vmem:[%s4210_s3 + $0x128] sm:$0xff]  ;;  %v2967_v51 = vld [vmem:[%s4210_s3 + $0x218] sm:$0xff] }
 0x12a   : > { %1719 = vmatmul.bf16.gmra.mxu2 %v3589_v47  ;;  %1402 = vmatpush.bf16.msrb.mxu3 %v2937_v48 }
 0x12b   : > { %v860_v57 = vshrl.u32 %v819_v53, 16  ;;  %v863_v63 = vshll.u32 %v819_v53, 16  ;;  %v718_v6 = vmax.f32 %v698_v58, 0.0  ;;  %2103 = vmatpush.bf16.msrb.mxu2 %v2967_v51 }
 0x12d   : > { %v862_v61 = vrot.slane %v860_v57, 7  ;;  %v766_v17 = vpack.c.bf16 %v718_v6, %v718_v6  ;;  %v572_v57 = vadd.f32 %v571_v32, %v3382_v31  ;;  %2056 = vmatpush.bf16.msrb.mxu1 %v2957_v55  ;;  %v2935_v6 = vld [vmem:[%s4210_s3 + $0x118] sm:$0xff]  ;;  %v2964_v32 = vld [vmem:[%s4210_s3 + $0x200] sm:$0xff] }
 0x12e   : > { %v644_v3 = vpop.f32.mrf.mxu2  ;;  %1403 = vmatpush.bf16.msrb.mxu3 %v2936_v56  ;;  %v1066_v56 = vrot.slane %v3508_v29, 1 }
 0x12f   : > { %v675_v7 = vadd.f32 %v644_v3, %v567_v50  ;;  %v865_v8 = vor.u32 %v863_v63, %v862_v61  ;;  %v3607_v9 = vsel %vm3479_vm5, %v862_v61, 0  ;;  %v806_v38 = vunpack.c.l.b16 %v766_v17  ;;  %v2966_v61 = vld [vmem:[%s4210_s3 + $0x210] sm:$0xff]  ;;  %v574_v31 = vpop.f32.mrf.mxu1 }
 0x130   : > { %v1006_v15 = vshll.u32 %v3607_v9, 16  ;;  %2104 = vmatpush.bf16.msrb.mxu2 %v2966_v61 }
 0x131   : > { %v699_v12 = vadd.f32 %v3460_v62, %v675_v7  ;;  %v3618_v13 = vsel %vm3479_vm5, 0, %v865_v8  ;;  %2057 = vmatpush.bf16.msrb.mxu1 %v2956_v4 }
 0x132   : > { %1379 = vmatmul.bf16.gmra.mxu0 %v3618_v13  ;;  %v1001_v14 = vshll.u32 %v3618_v13, 16  ;;  %v999_v23 = vshrl.u32 %v3618_v13, 16  ;;  %v1008_v35 = vrot.slane %v1006_v15, 1  ;;  %1404 = vmatpush.bf16.msrb.mxu3 %v2935_v6 }
 0x133   : > { %v719_v19 = vmax.f32 %v699_v12, 0.0  ;;  %1675 = vmatmul.bf16.gmra.mxu1 %v3618_v13  ;;  %v2965_v12 = vld [vmem:[%s4210_s3 + $0x208] sm:$0xff] }
 0x134   : > { %v1003_v24 = vrot.slane %v1001_v14, 1  ;;  %2105 = vmatpush.bf16.msrb.mxu2 %v2965_v12 }
 0x135   : > { %v767_v30 = vpack.c.bf16 %v719_v19, %v719_v19  ;;  %v575_v19 = vadd.f32 %v574_v31, %v3377_v28 }
 0x136   : > { %v647_v33 = vpop.f32.mrf.mxu2  ;;  %v1004_v34 = vor.u32 %v1003_v24, %v999_v23 }
 0x137   : > { %v807_v40 = vunpack.c.l.b16 %v767_v30  ;;  %v676_v42 = vadd.f32 %v647_v33, %v570_v27  ;;  %v2934_v30 = vld [vmem:[%s4210_s3 + $0x110] sm:$0xff] }
 0x138   : > { %v3639_v46 = vsel %vm937_vm7, %v1004_v34, %v1008_v35  ;;  %1405 = vmatpush.bf16.msrb.mxu3 %v2934_v30  ;;  %2106 = vmatpush.bf16.msrb.mxu2 %v2964_v32  ;;  %v1069_v30 = vrot.slane %v3539_v43, 1  ;;  %v1071_v43 = vrot.slane %v3575_v22, 1 }
 0x139   : > { %v820_v25 = vpack.c.b16 %v807_v40, %v806_v38  ;;  %v700_v53 = vadd.f32 %v3460_v62, %v676_v42  ;;  %v576_v38 = vpop.f32.mrf.mxu1  ;;  %v2933_v40 = vld [vmem:[%s4210_s3 + $0x108] sm:$0xff] }
 0x13a   : > { %1724 = vmatmul.bf16.gmra.mxu2 %v3639_v46  ;;  %v577_v48 = vadd.f32 %v576_v38, %v3393_v36  ;;  %v2921_v38 = vld [vmem:[%s4210_s3 + $0xa8] sm:$0xff] }
 0x13b   : > { %v867_v52 = vshrl.u32 %v820_v25, 16  ;;  %v870_v59 = vshll.u32 %v820_v25, 16  ;;  %v720_v63 = vmax.f32 %v700_v53, 0.0  ;;  %v2932_v25 = vld [vmem:[%s4210_s3 + $0x100] sm:$0xff]  ;;  %v1065_v53 = vrot.slane %v3513_v1, 1 }
 0x13c   : > { %1406 = vmatpush.bf16.msrb.mxu3 %v2933_v40 }
 0x13d   : > { %v869_v58 = vrot.slane %v867_v52, 7  ;;  %v768_v14 = vpack.c.bf16 %v720_v63, %v720_v63  ;;  %v3714_v63 = vsel %vm1058_vm6, %v1065_v53, %v1066_v56  ;;  %v2954_v53 = vld [vmem:[%s4210_s3 + $0x1b0] sm:$0xff] }
 0x13e   : > { %v649_v60 = vpop.f32.mrf.mxu2 }
 0x13f   : > { %v677_v50 = vadd.f32 %v649_v60, %v572_v57  ;;  %v872_v2 = vor.u32 %v870_v59, %v869_v58  ;;  %v3661_v3 = vsel %vm3479_vm5, %v869_v58, 0  ;;  %v808_v33 = vunpack.c.l.b16 %v768_v14 }
 0x140   : > { %v1018_v11 = vshll.u32 %v3661_v3, 16  ;;  %1407 = vmatpush.bf16.msrb.mxu3 %v2932_v25 }
 0x141   : > { %v701_v7 = vadd.f32 %v3460_v62, %v677_v50  ;;  %v3672_v8 = vsel %vm3479_vm5, 0, %v872_v2  ;;  %v2923_v2 = vld [vmem:[%s4210_s3 + $0xb8] sm:$0xff] }
 0x142   : > { %1384 = vmatmul.bf16.vlgmr.msra.gmra.mxu3 %v3672_v8  ;;  %1457 = vmatmul.bf16.vlgmr.msra.gmra.mxu0 %v3499_v39  ;;  %v1013_v10 = vshll.u32 %v3672_v8, 16  ;;  %v1011_v16 = vshrl.u32 %v3672_v8, 16  ;;  %v1020_v27 = vrot.slane %v1018_v11, 1 }
 0x143   : > { %v721_v15 = vmax.f32 %v701_v7, 0.0  ;;  %1680 = vmatmul.bf16.gmra.mxu1 %v3672_v8 }
 0x144   : > { %v1015_v17 = vrot.slane %v1013_v10, 1  ;;  %1740 = vmatpush.bf16.msra.mxu3 %v2923_v2  ;;  %v2951_v2 = vld [vmem:[%s4210_s3 + $0x198] sm:$0xff] }
 0x145   : > { %v769_v21 = vpack.c.bf16 %v721_v15, %v721_v15 }
 0x146   : > { %v652_v23 = vpop.f32.mrf.mxu2  ;;  %v1016_v24 = vor.u32 %v1015_v17, %v1011_v16 }
 0x147   : > { %v809_v34 = vunpack.c.l.b16 %v769_v21  ;;  %v678_v35 = vadd.f32 %v652_v23, %v575_v19 }
 0x148   : > { %v3691_v37 = vsel %vm937_vm7, %v1016_v24, %v1020_v27  ;;  %v1068_v24 = vrot.slane %v3544_v45, 1 }
 0x149   : > { %v821_v28 = vpack.c.b16 %v809_v34, %v808_v33  ;;  %v702_v26 = vadd.f32 %v3460_v62, %v678_v35  ;;  %v2922_v34 = vld [vmem:[%s4210_s3 + $0xb0] sm:$0xff]  ;;  %v1072_v35 = vrot.slane %v3570_v18, 1  ;;  %v1074_v18 = vrot.slane %v3618_v13, 1 }
 0x14a   : > { %1729 = vmatmul.bf16.gmra.mxu2 %v3691_v37  ;;  %v3739_v33 = vsel %vm1058_vm6, %v1068_v24, %v1069_v30  ;;  %1741 = vmatpush.bf16.msra.mxu3 %v2922_v34  ;;  %v2918_v30 = vld [vmem:[%s4210_s3 + $0x90] sm:$0xff] }
 0x14b   : > { %v874_v42 = vshrl.u32 %v821_v28, 16  ;;  %v877_v52 = vshll.u32 %v821_v28, 16  ;;  %v722_v57 = vmax.f32 %v702_v26, 0.0  ;;  %v3751_v28 = vsel %vm1058_vm6, %v1071_v43, %v1072_v35 }
 0x14d   : > { %v876_v51 = vrot.slane %v874_v42, 7  ;;  %v770_v4 = vpack.c.bf16 %v722_v57, %v722_v57  ;;  %v579_v42 = vpop.f32.mrf.mxu1 }
 0x14e   : > { %v654_v55 = vpop.f32.mrf.mxu2  ;;  %1742 = vmatpush.bf16.msra.mxu3 %v2921_v38 }
 0x14f   : > { %v679_v58 = vadd.f32 %v654_v55, %v577_v48  ;;  %v879_v59 = vor.u32 %v877_v52, %v876_v51  ;;  %v3706_v60 = vsel %vm3479_vm5, %v876_v51, 0  ;;  %v810_v14 = vunpack.c.l.b16 %v770_v4  ;;  %v2920_v51 = vld [vmem:[%s4210_s3 + $0xa0] sm:$0xff]  ;;  %v2955_v52 = vld [vmem:[%s4210_s3 + $0x1b8] sm:$0xff]  ;;  %v2953_v55 = vld [vmem:[%s4210_s3 + $0x1a8] sm:$0xff] }
 0x150   : > { %v1030_v50 = vshll.u32 %v3706_v60, 16  ;;  %2001 = vmatpush.bf16.msrb.mxu0 %v2955_v52 }
 0x151   : > { %v703_v61 = vadd.f32 %v3460_v62, %v679_v58  ;;  %v3711_v36 = vsel %vm3479_vm5, 0, %v879_v59  ;;  %v1077_v58 = vrot.slane %v3672_v8, 1  ;;  %v2952_v59 = vld [vmem:[%s4210_s3 + $0x1a0] sm:$0xff] }
 0x152   : > { %1389 = vmatmul.bf16.gmra.mxu3 %v3711_v36  ;;  %1462 = vmatmul.bf16.gmra.mxu0 %v3714_v63  ;;  %v1025_v29 = vshll.u32 %v3711_v36, 16  ;;  %v1023_v6 = vshrl.u32 %v3711_v36, 16  ;;  %v1032_v12 = vrot.slane %v1030_v50, 1  ;;  %v2919_v50 = vld [vmem:[%s4210_s3 + $0x98] sm:$0xff] }
 0x153   : > { %v723_v31 = vmax.f32 %v703_v61, 0.0  ;;  %1685 = vmatmul.bf16.gmra.mxu1 %v3711_v36  ;;  %1743 = vmatpush.bf16.msra.mxu3 %v2920_v51  ;;  %v1078_v61 = vrot.slane %v3661_v3, 1 }
 0x154   : > { %v1027_v7 = vrot.slane %v1025_v29, 1  ;;  %2002 = vmatpush.bf16.msrb.mxu0 %v2954_v53 }
 0x155   : > { %v771_v10 = vpack.c.bf16 %v723_v31, %v723_v31  ;;  %v3795_v29 = vsel %vm1058_vm6, %v1077_v58, %v1078_v61 }
 0x156   : > { %v1028_v11 = vor.u32 %v1027_v7, %v1023_v6  ;;  %v657_v48 = vpop.f32.mrf.mxu2  ;;  %v2949_v7 = vld [vmem:[%s4210_s3 + $0x188] sm:$0xff] }
 0x157   : > { %v811_v15 = vunpack.c.l.b16 %v771_v10  ;;  %1744 = vmatpush.bf16.msra.mxu3 %v2919_v50  ;;  %v580_v10 = vadd.f32 %v579_v42, %v3419_v44 }
 0x158   : > { %v3726_v16 = vsel %vm937_vm7, %v1028_v11, %v1032_v12  ;;  %2003 = vmatpush.bf16.msrb.mxu0 %v2953_v55 }
 0x159   : > { %v822_v17 = vpack.c.b16 %v811_v15, %v810_v14  ;;  %v1080_v14 = vrot.slane %v3711_v36, 1  ;;  %v680_v15 = vadd.f32 %v657_v48, %v580_v10 }
 0x15a   : > { %1734 = vmatmul.bf16.gmra.mxu2 %v3726_v16 }
 0x15b   : > { %v881_v19 = vshrl.u32 %v822_v17, 16  ;;  %v884_v21 = vshll.u32 %v822_v17, 16  ;;  %1745 = vmatpush.bf16.msra.mxu3 %v2918_v30  ;;  %v2916_v30 = vld [vmem:[%s4210_s3 + $0x80] sm:$0xff] }
 0x15c   : > { %2004 = vmatpush.bf16.msrb.mxu0 %v2952_v59  ;;  %v2917_v59 = vld [vmem:[%s4210_s3 + $0x88] sm:$0xff] }
 0x15d   : > { %v3729_v23 = vrot.slane %v881_v19, 7  ;;  %v1081_v19 = vrot.slane %v3706_v60, 1  ;;  %v732_v60 = vstv %s731_s9  ;;  %s3173_s9 = smov 124  }
 0x15e   : > { %v659_v56 = vpop.f32.mrf.mxu2  ;;  %vm733_vm8 = vcmp.eq.s32.totalorder %v732_v60, 1 }
 0x15f   : > { %v886_v27 = vor.u32 %v884_v21, %v3729_v23  ;;  %v3835_v24 = vsel %vm1058_vm6, %v1080_v14, %v1081_v19  ;;  %1746 = vmatpush.bf16.msra.mxu3 %v2917_v59 }
 0x160   : > { %2005 = vmatpush.bf16.msrb.mxu0 %v2951_v2 }
 0x161   : > { %v3736_v32 = vsel %vm3479_vm5, 0, %v886_v27  ;;  %v704_v27 = vadd.f32 %v3460_v62, %v680_v15 }
 0x162   : > { %1394 = vmatmul.bf16.gmra.mxu3 %v3736_v32  ;;  %1467 = vmatmul.bf16.gmra.mxu0 %v3739_v33  ;;  %v1154_v51 = vrot.slane %v3736_v32, 1  ;;  %v1142_v50 = vshll.u32 %v3736_v32, 16  ;;  %v1140_v10 = vshrl.u32 %v3736_v32, 16 }
 0x163   : > { %2058 = vmatmul.bf16.vlgmr.msrb.gmra.mxu1 %v3527_v20  ;;  %v724_v43 = vmax.f32 %v704_v27, 0.0  ;;  %1747 = vmatpush.bf16.msra.mxu3 %v2916_v30 }
 0x16a   : > { %2107 = vmatmul.bf16.vlgmr.msrb.gmra.mxu2 %v3714_v63 }
 0x16d   : > { %v3808_v3 = vpop.f32.mrf.mxu2 }
 0x16f   : > { %v3759_v40 = vpop.f32.mrf.mxu0 }
 0x172   : > { %1408 = vmatmul.bf16.vlgmr.msrb.gmra.mxu3 %v3502_v49  ;;  %1472 = vmatmul.bf16.gmra.mxu0 %v3751_v28  ;;  %v1075_v49 = vrot.slane %v3607_v9, 1  ;;  %v581_v9 = vpop.f32.mrf.mxu1 }
 0x173   : > { %2063 = vmatmul.bf16.gmra.mxu1 %v3558_v5  ;;  %v582_v6 = vadd.f32 %v581_v9, %v3439_v54  ;;  %v2948_v54 = vld [vmem:[%s4210_s3 + $0x180] sm:$0xff] }
 0x174   : > { %v3767_v25 = vsel %vm1058_vm6, %v1074_v18, %v1075_v49  ;;  %v935_v49 = vsel %vm3479_vm5, %v3729_v23, 0 }
 0x175   : > { %v681_v11 = vadd.f32 %v659_v56, %v582_v6  ;;  %v3825_v17 = vpop.f32.mrf.mxu2  ;;  %v1155_v9 = vrot.slane %v935_v49, 1 }
 0x177   : > { %v3763_v26 = vpop.f32.mrf.mxu0  ;;  %v705_v21 = vadd.f32 %v3460_v62, %v681_v11  ;;  %v752_v62 = vsel %vm733_vm8, %v724_v43, 0.0  ;;  %v1156_v56 = vsel %vm1058_vm6, %v1154_v51, %v1155_v9  ;;  %v1147_v11 = vshll.u32 %v935_v49, 16 }
 0x178   : > { %v772_v48 = vpack.c.bf16 %v752_v62, %v752_v62 }
 0x179   : > { %v725_v34 = vmax.f32 %v705_v21, 0.0  ;;  %v1149_v21 = vrot.slane %v1147_v11, 1 }
 0x17a   : > { %2112 = vmatmul.bf16.gmra.mxu2 %v3739_v33  ;;  %v3787_v57 = vpop.f32.mrf.mxu1  ;;  %v812_v53 = vunpack.c.l.b16 %v772_v48 }
 0x17b   : > { %v753_v38 = vsel %vm733_vm8, %v725_v34, 0.0 }
 0x17d   : > { %v3846_v42 = vpop.f32.mrf.mxu2 }
 0x182   : > { %1413 = vmatmul.bf16.gmra.mxu3 %v3527_v20  ;;  %1477 = vmatmul.bf16.gmra.mxu0 %v3767_v25  ;;  %v3781_v20 = vpop.f32.mrf.mxu0  ;;  %v3813_v31 = vpop.f32.mrf.mxu1 }
 0x183   : > { %2068 = vmatmul.bf16.gmra.mxu1 %v3589_v47 }
 0x185   : > { %v3858_v58 = vpop.f32.mrf.mxu2 }
 0x18a   : > { %2117 = vmatmul.bf16.gmra.mxu2 %v3751_v28  ;;  %v3805_v4 = vpop.f32.mrf.mxu0  ;;  %v3832_v44 = vpop.f32.mrf.mxu1 }
 0x192   : > { %1418 = vmatmul.bf16.gmra.mxu3 %v3558_v5  ;;  %1482 = vmatmul.bf16.gmra.mxu0 %v3795_v29  ;;  %v2950_v5 = vld [vmem:[%s4210_s3 + $0x190] sm:$0xff]  ;;  %v3822_v12 = vpop.f32.mrf.mxu0  ;;  %v3849_v18 = vpop.f32.mrf.mxu1 }
 0x193   : > { %2073 = vmatmul.bf16.gmra.mxu1 %v3639_v46  ;;  %2006 = vmatpush.bf16.msrb.mxu0 %v2950_v5  ;;  %v1144_v5 = vrot.slane %v1142_v50, 1 }
 0x195   : > { %v1145_v15 = vor.u32 %v1144_v5, %v1140_v10 }
 0x197   : > { %2007 = vmatpush.bf16.msrb.mxu0 %v2949_v7  ;;  %v3871_v7 = vpop.f32.mrf.mxu2  ;;  %v1150_v27 = vsel %vm937_vm7, %v1145_v15, %v1149_v21  ;;  %v3062_v15 = vld [vmem:[%s3313_s17 + $0x28] sm:$0xff] }
 0x19a   : > { %2122 = vmatmul.bf16.gmra.mxu2 %v3767_v25  ;;  %v3844_v35 = vpop.f32.mrf.mxu0  ;;  %v3865_v61 = vpop.f32.mrf.mxu1 }
 0x19b   : > { %2008 = vmatpush.bf16.msrb.mxu0 %v2948_v54 }
 0x1a2   : > { %1423 = vmatmul.bf16.gmra.mxu3 %v3589_v47  ;;  %1487 = vmatmul.bf16.gmra.mxu0 %v3835_v24  ;;  %v773_v47 = vpack.c.bf16 %v753_v38, %v753_v38  ;;  %v3855_v55 = vpop.f32.mrf.mxu0  ;;  %v3874_v54 = vpop.f32.mrf.mxu1 }
 0x1a3   : > { %2078 = vmatmul.bf16.gmra.mxu1 %v3691_v37  ;;  %v3890_v38 = vpop.f32.mrf.mxu2 }
 0x1a4   : > { %v813_v52 = vunpack.c.l.b16 %v773_v47 }
 0x1a6   : > { %v823_v23 = vpack.c.b16 %v813_v52, %v812_v53 }
 0x1a8   : > { %v888_v2 = vshrl.u32 %v823_v23, 16  ;;  %v891_v14 = vshll.u32 %v823_v23, 16 }
 0x1aa   : > { %2127 = vmatmul.bf16.gmra.mxu2 %v3795_v29  ;;  %v3869_v6 = vpop.f32.mrf.mxu0 }
 0x1ab   : > { %v3902_v53 = vpop.f32.mrf.mxu2 }
 0x1b2   : > { %1428 = vmatmul.bf16.gmra.mxu3 %v3639_v46  ;;  %1492 = vmatmul.bf16.gmra.mxu0 %v1156_v56  ;;  %v890_v46 = vrot.slane %v888_v2, 7  ;;  %v3886_v34 = vpop.f32.mrf.mxu0 }
 0x1b3   : > { %2083 = vmatmul.bf16.gmra.mxu1 %v3726_v16  ;;  %v3916_v10 = vpop.f32.mrf.mxu2 }
 0x1b4   : > { %v893_v19 = vor.u32 %v891_v14, %v890_v46  ;;  %v936_v62 = vsel %vm3479_vm5, %v890_v46, 0  ;;  %v3061_v14 = vld [vmem:[%s3313_s17 + $0x20] sm:$0xff] }
 0x1b5   : > { %v1797_v48 = vshll.u32 %v936_v62, 16  ;;  %v1805_v5 = vrot.slane %v936_v62, 1 }
 0x1b6   : > { %v3884_v60 = vsel %vm3479_vm5, 0, %v893_v19  ;;  %v2184_v19 = vpack.c.bf16 %v3062_v15, %v3061_v14 }
 0x1b7   : > { %v1790_v49 = vshrl.u32 %v3884_v60, 16  ;;  %v1799_v59 = vrot.slane %v1797_v48, 1 }
 0x1b8   : > { %2205 = vrot.lane.b32.xlu0 %v2184_v19, %s3173_s9  ;;  %v3067_v19 = vld [vmem:[%s3313_s17 + $0x50] sm:$0xff] }
 0x1ba   : > { %2132 = vmatmul.bf16.gmra.mxu2 %v3835_v24  ;;  %v3900_v9 = vpop.f32.mrf.mxu0 }
 0x1c2   : > { %1433 = vmatmul.bf16.gmra.mxu3 %v3691_v37  ;;  %2009 = vmatmul.bf16.vlgmr.msrb.gmra.mxu0 %v3513_v1  ;;  %v1792_v1 = vshll.u32 %v3884_v60, 16  ;;  %v3893_v37 = vpop.f32.mrf.mxu1 }
 0x1c3   : > { %2088 = vmatmul.bf16.gmra.mxu1 %v1150_v27 }
 0x1c4   : > { %v1794_v47 = vrot.slane %v1792_v1, 1 }
 0x1c5   : > { %v3888_v43 = vpop.f32.mrf.mxu3 }
 0x1c6   : > { %v1795_v52 = vor.u32 %v1794_v47, %v1790_v49  ;;  %v3063_v47 = vld [vmem:[%s3313_s17 + $0x30] sm:$0xff]  ;;  %v3064_v49 = vld [vmem:[%s3313_s17 + $0x38] sm:$0xff] }
 0x1c7   : > { %v2185_v48 = vpack.c.bf16 %v3064_v49, %v3063_v47  ;;  %v3068_v47 = vld [vmem:[%s3313_s17 + $0x58] sm:$0xff] }
 0x1c8   : > { %v1800_v41 = vsel %vm937_vm7, %v1795_v52, %v1799_v59 }
 0x1c9   : > { %2207 = vrot.lane.b32.xlu0 %v2185_v48, %s3173_s9 }
 0x1ca   : > { %2137 = vmatmul.bf16.gmra.mxu2 %v1156_v56  ;;  %v2192_v56 = vld [vmem:[%s4212_s5] sm:$0x3]  ;;  %v3910_v23 = vpop.f32.mrf.mxu1 }
 0x1cb   : > { %v2248_v50 = vsel %vm2246_vm9, %v2192_v56, 0 }
 0x1cc   : > { %2257 = vmatpush.bf16.msrb.mxu3 %v2248_v50  ;;  %v3065_v50 = vld [vmem:[%s3313_s17 + $0x40] sm:$0xff] }
 0x1cd   : > { %v3898_v51 = vpop.f32.mrf.mxu3 }
 0x1d2   : > { %1438 = vmatmul.bf16.gmra.mxu3 %v3726_v16  ;;  %2014 = vmatmul.bf16.gmra.mxu0 %v3544_v45  ;;  %v1804_v16 = vrot.slane %v3884_v60, 1  ;;  %v1458_v45 = vpop.f32.mrf.mxu0 }
 0x1d3   : > { %2093 = vmatmul.bf16.gmra.mxu1 %v1800_v41 }
 0x1d4   : > { %v1806_v46 = vsel %vm1058_vm6, %v1804_v16, %v1805_v5  ;;  %v3066_v16 = vld [vmem:[%s3313_s17 + $0x48] sm:$0xff] }
 0x1d5   : > { %v3912_v2 = vpop.f32.mrf.mxu3  ;;  %v2186_v5 = vpack.c.bf16 %v3066_v16, %v3065_v50  ;;  %v3069_v16 = vld [vmem:[%s3313_s17 + $0x60] sm:$0xff] }
 0x1d7   : > { %2209 = vrot.lane.b32.xlu1 %v2186_v5, %s3173_s9 }
 0x1da   : > { %2142 = vmatmul.bf16.gmra.mxu2 %v1806_v46  ;;  %v1460_v21 = vpop.f32.mrf.mxu0 }
 0x1dd   : > { %v3918_v11 = vpop.f32.mrf.mxu3 }
 0x1e2   : > { %1443 = vmatmul.bf16.gmra.mxu3 %v1150_v27  ;;  %2019 = vmatmul.bf16.gmra.mxu0 %v3575_v22  ;;  %v1463_v1 = vpop.f32.mrf.mxu0 }
 0x1e5   : > { %v3924_v30 = vpop.f32.mrf.mxu3 }
 0x1ea   : > { %v1465_v52 = vpop.f32.mrf.mxu0 }
 0x1ed   : > { %v3926_v62 = vpop.f32.mrf.mxu3 }
 0x1f2   : > { %1748 = vmatmul.bf16.vlgmr.msra.gmra.mxu3 %v3489_v0  ;;  %2024 = vmatmul.bf16.gmra.mxu0 %v3618_v13  ;;  %v1468_v0 = vpop.f32.mrf.mxu0 }
 0x1f5   : > { %v1409_v27 = vpop.f32.mrf.mxu3 }
 0x1f6   : > { %v1410_v22 = vadd.f32 %v1409_v27, %v3759_v40 }
 0x1f8   : > { %v3934_v59 = vadd.f32 %v1458_v45, %v1410_v22 }
 0x1fa   : > { %v1470_v14 = vpop.f32.mrf.mxu0 }
 0x1fd   : > { %v1411_v41 = vpop.f32.mrf.mxu3 }
 0x1fe   : > { %v1412_v56 = vadd.f32 %v1411_v41, %v3763_v26 }
 0x200   : > { %v3939_v46 = vadd.f32 %v1460_v21, %v1412_v56  ;;  %v2187_v21 = vpack.c.bf16 %v3068_v47, %v3067_v19  ;;  %v3073_v19 = vld [vmem:[%s3313_s17 + $0x70] sm:$0xff]  ;;  %v3074_v47 = vld [vmem:[%s3313_s17 + $0x78] sm:$0xff] }
 0x202   : > { %1753 = vmatmul.bf16.gmra.mxu3 %v3499_v39  ;;  %2029 = vmatmul.bf16.gmra.mxu0 %v3672_v8  ;;  %v1473_v39 = vpop.f32.mrf.mxu0 }
 0x203   : > { %2211 = vrot.lane.b32.xlu1 %v2187_v21, %s3173_s9  ;;  %v2189_v21 = vpack.c.bf16 %v3074_v47, %v3073_v19 }
 0x205   : > { %v1414_v13 = vpop.f32.mrf.mxu3 }
 0x206   : > { %v1415_v40 = vadd.f32 %v1414_v13, %v3781_v20 }
 0x208   : > { %v3945_v45 = vadd.f32 %v1463_v1, %v1415_v40 }
 0x20a   : > { %v1475_v27 = vpop.f32.mrf.mxu0 }
 0x20d   : > { %v1416_v26 = vpop.f32.mrf.mxu3 }
 0x20e   : > { %v1417_v15 = vadd.f32 %v1416_v26, %v3805_v4 }
 0x210   : > { %v3950_v49 = vadd.f32 %v1465_v52, %v1417_v15 }
 0x212   : > { %1758 = vmatmul.bf16.gmra.mxu3 %v3714_v63  ;;  %2034 = vmatmul.bf16.gmra.mxu0 %v3711_v36 }
 0x215   : > { %v1419_v8 = vpop.f32.mrf.mxu3 }
 0x216   : > { %v1420_v20 = vadd.f32 %v1419_v8, %v3822_v12  ;;  %v1478_v12 = vpop.f32.mrf.mxu0 }
 0x218   : > { %v3956_v1 = vadd.f32 %v1468_v0, %v1420_v20 }
 0x21d   : > { %v1421_v48 = vpop.f32.mrf.mxu3 }
 0x21e   : > { %v1422_v4 = vadd.f32 %v1421_v48, %v3844_v35  ;;  %v3075_v48 = vld [vmem:[%s3313_s17 + $0x90] sm:$0xff] }
 0x220   : > { %v3959_v22 = vadd.f32 %v1470_v14, %v1422_v4  ;;  %v3076_v4 = vld [vmem:[%s3313_s17 + $0x98] sm:$0xff] }
 0x222   : > { %1763 = vmatmul.bf16.gmra.mxu3 %v3739_v33  ;;  %2039 = vmatmul.bf16.gmra.mxu0 %v3736_v32  ;;  %v1480_v33 = vpop.f32.mrf.mxu0 }
 0x225   : > { %v1424_v63 = vpop.f32.mrf.mxu3 }
 0x226   : > { %v1425_v36 = vadd.f32 %v1424_v63, %v3855_v55  ;;  %v3070_v55 = vld [vmem:[%s3313_s17 + $0x68] sm:$0xff] }
 0x227   : > { %v2188_v5 = vpack.c.bf16 %v3070_v55, %v3069_v16 }
 0x228   : > { %v3964_v52 = vadd.f32 %v1473_v39, %v1425_v36 }
 0x229   : > { %2213 = vrot.lane.b32.xlu2 %v2188_v5, %s3173_s9 }
 0x22d   : > { %v1426_v41 = vpop.f32.mrf.mxu3 }
 0x22e   : > { %v1427_v56 = vadd.f32 %v1426_v41, %v3869_v6  ;;  %v1483_v6 = vpop.f32.mrf.mxu0 }
 0x230   : > { %v3967_v35 = vadd.f32 %v1475_v27, %v1427_v56  ;;  %v2191_v27 = vpack.c.bf16 %v3076_v4, %v3075_v48 }
 0x231   : > { %2215 = vrot.lane.b32.xlu2 %v2189_v21, %s3173_s9 }
 0x232   : > { %1768 = vmatmul.bf16.gmra.mxu3 %v3751_v28  ;;  %2044 = vmatmul.bf16.gmra.mxu0 %v3884_v60  ;;  %v3071_v28 = vld [vmem:[%s3313_s17 + $0x80] sm:$0xff]  ;;  %v3072_v60 = vld [vmem:[%s3313_s17 + $0x88] sm:$0xff] }
 0x233   : > { %v2190_v14 = vpack.c.bf16 %v3072_v60, %v3071_v28  ;;  %2219 = vrot.lane.b32.xlu1 %v2191_v27, %s3173_s9  ;;  %v1671_v60 = vpop.f32.mrf.mxu1 }
 0x235   : > { %v1429_v50 = vpop.f32.mrf.mxu3  ;;  %2217 = vrot.lane.b32.xlu0 %v2190_v14, %s3173_s9  ;;  %s2360_s9 = sadd.s32 %s2972_s22, %s2893_s23 }
 0x236   : > { %v1430_v32 = vadd.f32 %v1429_v50, %v3886_v34  ;;  %v1485_v39 = vpop.f32.mrf.mxu0  ;;  %s2894_s17 = sshll.u32 %s2360_s9, 3 }
 0x237   : > { %s2362_s13 = scalar_lea.hbm %s4214_s7, %s2894_s17 }
 0x238   : > { %v3974_v0 = vadd.f32 %v1478_v12, %v1430_v32  ;;  %s2365_s10 = sshll.u32 %s2362_s13, 4  ;;  %s2366_s10 = int_to_ptr.hbm [resolvable:$true] %s2365_s10 }
 0x239   : > { %s3091_s22 = sshra.s32 %s2366_s10, 4  ;;  %s3092_s22 = int_to_ptr.hbm [resolvable:$true] %s3091_s22 }
 0x23a   : > { %s3093_s23 = scalar_lea.hbm %s3092_s22, 128  ;;  %p3098_p5 = scmp.lt.s32.totalorder %s3092_s22, %s4214_s7 }
 0x23b   : > { %v1673_v21 = vpop.f32.mrf.mxu1  ;;  %p3094_p1 = scmp.ne.s32.totalorder %s3092_s22, %s3093_s23  ;;  %p3099_p6 = scmp.lt.s32.totalorder %s3097_s27, %s3093_s23 }
 0x23d   : > { %v1431_v13 = vpop.f32.mrf.mxu3  ;;  %p3095_p2 = pnand %p3094_p1, %p3267_p3  ;;  %p3100_p7 = por %p3099_p6, %p3098_p5 }
 0x23e   : > { %v1432_v40 = vadd.f32 %v1431_v13, %v3900_v9 }
 0x23f   : > { %p3096_p4 = pneg %p3095_p2 }
 0x240   : > { %v3980_v26 = vadd.f32 %v1480_v33, %v1432_v40 }
 0x241   : > { %p3101_p9 = pnand %p3100_p7, %p3096_p4 }
 0x242   : > { %1773 = vmatmul.bf16.gmra.mxu3 %v3767_v25  ;;  %v1488_v25 = vpop.f32.mrf.mxu0 }
 0x245   : > { %v1434_v34 = vpop.f32.mrf.mxu3 }
 0x246   : > { %v1435_v15 = vadd.f32 %v1434_v34, %v3888_v43 }
 0x248   : > { %v3987_v8 = vadd.f32 %v1483_v6, %v1435_v15  ;;  %v2206_v6 = vpop.permute.xlu0 %2205 }
 0x24a   : > { %v1490_v41 = vpop.f32.mrf.mxu0 }
 0x24d   : > { %v1436_v9 = vpop.f32.mrf.mxu3 }
 0x24e   : > { %v1437_v20 = vadd.f32 %v1436_v9, %v3898_v51 }
 0x250   : > { %v3993_v63 = vadd.f32 %v1485_v39, %v1437_v20  ;;  %v2208_v15 = vpop.permute.xlu0 %2207  ;;  %v2210_v20 = vpop.permute.xlu1 %2209 }
 0x252   : > { %1778 = vmatmul.bf16.gmra.mxu3 %v3795_v29  ;;  %v1493_v50 = vpop.f32.mrf.mxu0 }
 0x255   : > { %v1439_v43 = vpop.f32.mrf.mxu3 }
 0x256   : > { %v1440_v36 = vadd.f32 %v1439_v43, %v3912_v2 }
 0x258   : > { %v3998_v12 = vadd.f32 %v1488_v25, %v1440_v36 }
 0x25a   : > { %v1495_v2 = vpop.f32.mrf.mxu0 }
 0x25d   : > { %v1441_v56 = vpop.f32.mrf.mxu3 }
 0x25e   : > { %v1442_v33 = vadd.f32 %v1441_v56, %v3918_v11  ;;  %v1652_v11 = vadd.f32 %v3787_v57, %v3934_v59  ;;  %v1657_v57 = vadd.f32 %v3832_v44, %v3945_v45  ;;  %v1720_v59 = vpop.f32.mrf.mxu2  ;;  %v1662_v44 = vadd.f32 %v3865_v61, %v3956_v1  ;;  %v1676_v45 = vpop.f32.mrf.mxu1 }
 0x25f   : > { %v1667_v1 = vadd.f32 %v3893_v37, %v3964_v52  ;;  %v1672_v37 = vadd.f32 %v1671_v60, %v3974_v0 }
 0x260   : > { %v4001_v51 = vadd.f32 %v1490_v41, %v1442_v33 }
 0x261   : > { %v1721_v52 = vadd.f32 %v1720_v59, %v1672_v37  ;;  %v4086_v37 = vld [vmem:[%s4211_s4] ss:$0 sm:$0xff] }
 0x262   : > { %1783 = vmatmul.bf16.gmra.mxu3 %v3835_v24  ;;  %v1701_v24 = vadd.f32 %v3808_v3, %v1652_v11  ;;  %v1706_v3 = vadd.f32 %v3846_v42, %v1657_v57  ;;  %v1711_v42 = vadd.f32 %v3871_v7, %v1662_v44  ;;  %v1716_v7 = vadd.f32 %v3902_v53, %v1667_v1 }
 0x265   : > { %v1444_v32 = vpop.f32.mrf.mxu3 }
 0x266   : > { %v1445_v16 = vadd.f32 %v1444_v32, %v3924_v30  ;;  %v1654_v30 = vadd.f32 %v3813_v31, %v3939_v46  ;;  %v1659_v31 = vadd.f32 %v3849_v18, %v3950_v49  ;;  %v1664_v18 = vadd.f32 %v3874_v54, %v3959_v22 }
 0x267   : > { %v1669_v54 = vadd.f32 %v3910_v23, %v3967_v35 }
 0x268   : > { %v4005_v55 = vadd.f32 %v1493_v50, %v1445_v16  ;;  %v1708_v46 = vadd.f32 %v3858_v58, %v1659_v31  ;;  %v1678_v58 = vpop.f32.mrf.mxu1  ;;  %v1713_v49 = vadd.f32 %v3890_v38, %v1664_v18 }
 0x269   : > { %v1718_v22 = vadd.f32 %v3916_v10, %v1669_v54  ;;  %v1679_v57 = vadd.f32 %v1678_v58, %v3993_v63 }
 0x26d   : > { %v1446_v29 = vpop.f32.mrf.mxu3 }
 0x26e   : > { %v1447_v5 = vadd.f32 %v1446_v29, %v3926_v62  ;;  %v1703_v62 = vadd.f32 %v3825_v17, %v1654_v30  ;;  %v1722_v17 = vpop.f32.mrf.mxu2  ;;  %v1677_v30 = vadd.f32 %v1676_v45, %v3987_v8 }
 0x270   : > { %v4008_v13 = vadd.f32 %v1495_v2, %v1447_v5  ;;  %v1681_v41 = vpop.f32.mrf.mxu1 }
 0x272   : > { %2882 = vmatmul.msk.bf16.vlgmr.msrb.gmra.mxu3 %vm2221_vm10, %v2206_v6  ;;  %v1674_v6 = vadd.f32 %v1673_v21, %v3980_v26  ;;  %v2010_v26 = vpop.f32.mrf.mxu0 }
 0x274   : > { %v1723_v35 = vadd.f32 %v1722_v17, %v1674_v6  ;;  %v1682_v17 = vadd.f32 %v1681_v41, %v3998_v12 }
 0x275   : > { %v1749_v40 = vpop.f32.mrf.mxu3  ;;  %v2212_v61 = vpop.permute.xlu1 %2211 }
 0x276   : > { %v4014_v28 = vadd.f32 %v1749_v40, %v1701_v24  ;;  %v1725_v48 = vpop.f32.mrf.mxu2 }
 0x278   : > { %v1683_v16 = vpop.f32.mrf.mxu1 }
 0x279   : > { %v1684_v63 = vadd.f32 %v1683_v16, %v4001_v51 }
 0x27d   : > { %v1751_v14 = vpop.f32.mrf.mxu3 }
 0x27e   : > { %v4019_v34 = vadd.f32 %v1751_v14, %v1703_v62  ;;  %v1727_v36 = vpop.f32.mrf.mxu2  ;;  %v1726_v62 = vadd.f32 %v1725_v48, %v1677_v30 }
 0x27f   : > { %v1728_v59 = vadd.f32 %v1727_v36, %v1679_v57 }
 0x280   : > { %v1686_v23 = vpop.f32.mrf.mxu1 }
 0x281   : > { %v1687_v12 = vadd.f32 %v1686_v23, %v4005_v55 }
 0x282   : > { %2883 = vmatmul.msk.bf16.gmra.mxu3 %vm2221_vm10, %v2208_v15 }
 0x283   : > { %v2214_v29 = vpop.permute.xlu2 %2213 }
 0x285   : > { %v1754_v19 = vpop.f32.mrf.mxu3 }
 0x286   : > { %v4025_v47 = vadd.f32 %v1754_v19, %v1706_v3  ;;  %v1730_v38 = vpop.f32.mrf.mxu2 }
 0x288   : > { %v1688_v0 = vpop.f32.mrf.mxu1 }
 0x289   : > { %v1689_v51 = vadd.f32 %v1688_v0, %v4008_v13  ;;  %v4091_v13 = vld [vmem:[%s4213_s6] ss:$0 sm:$0xff] }
 0x28b   : > { %v2216_v40 = vpop.permute.xlu2 %2215 }
 0x28d   : > { %v1756_v39 = vpop.f32.mrf.mxu3 }
 0x28e   : > { %v4030_v9 = vadd.f32 %v1756_v39, %v1708_v46  ;;  %v1732_v53 = vpop.f32.mrf.mxu2  ;;  %v1731_v46 = vadd.f32 %v1730_v38, %v1682_v17  ;;  %v2012_v39 = vpop.f32.mrf.mxu0 }
 0x28f   : > { %v1733_v48 = vadd.f32 %v1732_v53, %v1684_v63 }
 0x290   : > { %v2059_v3 = vpop.f32.mrf.mxu1 }
 0x291   : > { %v2060_v54 = vadd.f32 %v2059_v3, %v2010_v26 }
 0x292   : > { %2884 = vmatmul.msk.bf16.gmra.mxu3 %vm2221_vm10, %v2210_v20 }
 0x295   : > { %v1759_v4 = vpop.f32.mrf.mxu3 }
 0x296   : > { %v4036_v27 = vadd.f32 %v1759_v4, %v1711_v42  ;;  %v1735_v11 = vpop.f32.mrf.mxu2  ;;  %v2015_v58 = vpop.f32.mrf.mxu0 }
 0x297   : > { %v1736_v36 = vadd.f32 %v1735_v11, %v1687_v12 }
 0x298   : > { %v2061_v45 = vpop.f32.mrf.mxu1 }
 0x29d   : > { %v1761_v25 = vpop.f32.mrf.mxu3 }
 0x29e   : > { %v4041_v43 = vadd.f32 %v1761_v25, %v1713_v49  ;;  %v1737_v15 = vpop.f32.mrf.mxu2  ;;  %v2017_v41 = vpop.f32.mrf.mxu0 }
 0x29f   : > { %v1738_v38 = vadd.f32 %v1737_v15, %v1689_v51 }
 0x2a0   : > { %v2064_v25 = vpop.f32.mrf.mxu1 }
 0x2a1   : > { %v2065_v0 = vadd.f32 %v2064_v25, %v2015_v58 }
 0x2a2   : > { %2885 = vmatmul.msk.bf16.gmra.mxu3 %vm2221_vm10, %v2212_v61 }
 0x2a5   : > { %v1764_v56 = vpop.f32.mrf.mxu3  ;;  %v2220_v49 = vpop.permute.xlu1 %2219 }
 0x2a6   : > { %v4047_v33 = vadd.f32 %v1764_v56, %v1716_v7  ;;  %v2108_v8 = vpop.f32.mrf.mxu2  ;;  %v2020_v53 = vpop.f32.mrf.mxu0 }
 0x2a7   : > { %v2218_v31 = vpop.permute.xlu0 %2217  ;;  %v2109_v16 = vadd.f32 %v2108_v8, %v2060_v54 }
 0x2a8   : > { %v2066_v56 = vpop.f32.mrf.mxu1 }
 0x2a9   : > { %v2067_v17 = vadd.f32 %v2066_v56, %v2017_v41 }
 0x2ad   : > { %v1766_v50 = vpop.f32.mrf.mxu3 }
 0x2ae   : > { %v4052_v32 = vadd.f32 %v1766_v50, %v1718_v22  ;;  %v2110_v42 = vpop.f32.mrf.mxu2 }
 0x2b2   : > { %2886 = vmatmul.msk.bf16.gmra.mxu3 %vm2221_vm10, %v2214_v29  ;;  %v2148_v29 = vadd.f32 %v2109_v16, %v4014_v28 }
 0x2b4   : > { %v2168_v23 = vadd.f32 %v4086_v37, %v2148_v29 }
 0x2b5   : > { %v1769_v5 = vpop.f32.mrf.mxu3 }
 0x2b6   : > { %v4056_v2 = vadd.f32 %v1769_v5, %v1721_v52  ;;  %v2113_v61 = vpop.f32.mrf.mxu2  ;;  %v2062_v52 = vadd.f32 %v2061_v45, %v2012_v39  ;;  %v2069_v5 = vpop.f32.mrf.mxu1 }
 0x2b7   : > { %v2070_v58 = vadd.f32 %v2069_v5, %v2020_v53 }
 0x2bd   : > { %v1771_v10 = vpop.f32.mrf.mxu3 }
 0x2be   : > { %v4059_v24 = vadd.f32 %v1771_v10, %v1723_v35  ;;  %v2115_v55 = vpop.f32.mrf.mxu2  ;;  %v2111_v35 = vadd.f32 %v2110_v42, %v2062_v52  ;;  %v2071_v26 = vpop.f32.mrf.mxu1 }
 0x2bf   : > { %v2116_v45 = vadd.f32 %v2115_v55, %v2067_v17 }
 0x2c2   : > { %2887 = vmatmul.msk.bf16.gmra.mxu3 %vm2221_vm10, %v2216_v40  ;;  %v2149_v40 = vadd.f32 %v2111_v35, %v4019_v34 }
 0x2c4   : > { %v2169_v15 = vadd.f32 %v4086_v37, %v2149_v40 }
 0x2c5   : > { %v1774_v60 = vpop.f32.mrf.mxu3 }
 0x2c6   : > { %v4063_v14 = vadd.f32 %v1774_v60, %v1726_v62  ;;  %v2118_v10 = vpop.f32.mrf.mxu2  ;;  %v2022_v62 = vpop.f32.mrf.mxu0 }
 0x2c7   : > { %v2074_v42 = vpop.f32.mrf.mxu1  ;;  %v2072_v54 = vadd.f32 %v2071_v26, %v2022_v62 }
 0x2cd   : > { %v1776_v19 = vpop.f32.mrf.mxu3 }
 0x2ce   : > { %v4066_v21 = vadd.f32 %v1776_v19, %v1728_v59  ;;  %v2114_v59 = vadd.f32 %v2113_v61, %v2065_v0 }
 0x2cf   : > { %v2076_v56 = vpop.f32.mrf.mxu1 }
 0x2d0   : > { %v2150_v19 = vadd.f32 %v2114_v59, %v4025_v47 }
 0x2d2   : > { %2888 = vmatmul.msk.bf16.gmra.mxu3 %vm2221_vm10, %v2218_v31  ;;  %v2120_v31 = vpop.f32.mrf.mxu2 }
 0x2d3   : > { %v2121_v16 = vadd.f32 %v2120_v31, %v2072_v54 }
 0x2d5   : > { %v1779_v20 = vpop.f32.mrf.mxu3  ;;  %v2153_v53 = vadd.f32 %v2121_v16, %v4041_v43 }
 0x2d6   : > { %v4070_v44 = vadd.f32 %v1779_v20, %v1731_v46  ;;  %v2170_v46 = vadd.f32 %v4086_v37, %v2150_v19  ;;  %v2025_v20 = vpop.f32.mrf.mxu0 }
 0x2da   : > { %v2123_v47 = vpop.f32.mrf.mxu2 }
 0x2dd   : > { %v1781_v4 = vpop.f32.mrf.mxu3 }
 0x2de   : > { %v4073_v18 = vadd.f32 %v1781_v4, %v1733_v48  ;;  %v2151_v48 = vadd.f32 %v2116_v45, %v4030_v9 }
 0x2e0   : > { %v2171_v12 = vadd.f32 %v4086_v37, %v2151_v48 }
 0x2e2   : > { %2889 = vmatmul.msk.bf16.gmra.mxu3 %vm2221_vm10, %v2220_v49  ;;  %v2125_v55 = vpop.f32.mrf.mxu2 }
 0x2e5   : > { %v1784_v1 = vpop.f32.mrf.mxu3 }
 0x2e6   : > { %v4077_v7 = vadd.f32 %v1784_v1, %v1736_v36  ;;  %v2119_v36 = vadd.f32 %v2118_v10, %v2070_v58  ;;  %v2027_v1 = vpop.f32.mrf.mxu0 }
 0x2e7   : > { %v2077_v62 = vadd.f32 %v2076_v56, %v2027_v1 }
 0x2e8   : > { %v2152_v51 = vadd.f32 %v2119_v36, %v4036_v27  ;;  %v2079_v27 = vpop.f32.mrf.mxu1 }
 0x2e9   : > { %v2126_v59 = vadd.f32 %v2125_v55, %v2077_v62 }
 0x2ea   : > { %v2128_v40 = vpop.f32.mrf.mxu2 }
 0x2eb   : > { %v2155_v19 = vadd.f32 %v2126_v59, %v4052_v32 }
 0x2ed   : > { %v1786_v22 = vpop.f32.mrf.mxu3 }
 0x2ee   : > { %v4080_v50 = vadd.f32 %v1786_v22, %v1738_v38  ;;  %v2172_v38 = vadd.f32 %v4086_v37, %v2152_v51  ;;  %v2030_v5 = vpop.f32.mrf.mxu0 }
 0x2ef   : > { %v2080_v17 = vadd.f32 %v2079_v27, %v2030_v5 }
 0x2f0   : > { %v2081_v26 = vpop.f32.mrf.mxu1 }
 0x2f2   : > { %v2130_v31 = vpop.f32.mrf.mxu2 }
 0x2f5   : > { %v2259_v6 = vpop.f32.mrf.mxu3 }
 0x2f6   : > { %v2260_v28 = vadd.f32 %v4091_v13, %v2259_v6  ;;  %v2075_v6 = vadd.f32 %v2074_v42, %v2025_v20  ;;  %v2032_v43 = vpop.f32.mrf.mxu0  ;;  %v2129_v20 = vadd.f32 %v2128_v40, %v2080_v17 }
 0x2f8   : > { %v2299_v11 = vadd.f32 %v2260_v28, %v2168_v23  ;;  %v2173_v28 = vadd.f32 %v4086_v37, %v2153_v53  ;;  %v2156_v42 = vadd.f32 %v2129_v20, %v4056_v2 }
 0x2fa   : > { %v2315_v30 = vmax.f32 %v2299_v11, 0.0  ;;  %v2124_v11 = vadd.f32 %v2123_v47, %v2075_v6  ;;  %v2133_v32 = vpop.f32.mrf.mxu2  ;;  %v2176_v47 = vadd.f32 %v4086_v37, %v2156_v42 }
 0x2fc   : > { %2331 = vst [vmem:[%s4099_s21] sm:$0xff] %v2315_v30  ;;  %v2154_v30 = vadd.f32 %v2124_v11, %v4047_v33 }
 0x2fd   : > { %v2261_v60 = vpop.f32.mrf.mxu3 }
 0x2fe   : > { %v2262_v57 = vadd.f32 %v4091_v13, %v2261_v60 }
 0x300   : > { %v2300_v3 = vadd.f32 %v2262_v57, %v2169_v15  ;;  %v2174_v15 = vadd.f32 %v4086_v37, %v2154_v30 }
 0x302   : > { %v2316_v34 = vmax.f32 %v2300_v3, 0.0 }
 0x304   : > { %2332 = vst [vmem:[%s4099_s21 + $0x8] sm:$0xff] %v2316_v34 }
 0x305   : > { %v2264_v8 = vpop.f32.mrf.mxu3 }
 0x306   : > { %v2265_v39 = vadd.f32 %v4091_v13, %v2264_v8  ;;  %v2175_v8 = vadd.f32 %v4086_v37, %v2155_v19 }
 0x308   : > { %v2301_v63 = vadd.f32 %v2265_v39, %v2170_v46  ;;  %v2035_v39 = vpop.f32.mrf.mxu0 }
 0x30a   : > { %v2317_v4 = vmax.f32 %v2301_v63, 0.0  ;;  %v2084_v63 = vpop.f32.mrf.mxu1 }
 0x30c   : > { %2333 = vst [vmem:[%s4099_s21 + $0x10] sm:$0xff] %v2317_v4  ;;  %v2082_v4 = vadd.f32 %v2081_v26, %v2032_v43 }
 0x30d   : > { %v2266_v49 = vpop.f32.mrf.mxu3 }
 0x30e   : > { %v2267_v25 = vadd.f32 %v4091_v13, %v2266_v49 }
 0x310   : > { %v2302_v61 = vadd.f32 %v2267_v25, %v2171_v12  ;;  %v2131_v12 = vadd.f32 %v2130_v31, %v2082_v4  ;;  %v2037_v36 = vpop.f32.mrf.mxu0 }
 0x312   : > { %v2318_v41 = vmax.f32 %v2302_v61, 0.0  ;;  %v2157_v61 = vadd.f32 %v2131_v12, %v4059_v24  ;;  %v2086_v51 = vpop.f32.mrf.mxu1 }
 0x313   : > { %v2087_v53 = vadd.f32 %v2086_v51, %v2037_v36 }
 0x314   : > { %2334 = vst [vmem:[%s4099_s21 + $0x18] sm:$0xff] %v2318_v41  ;;  %v2085_v41 = vadd.f32 %v2084_v63, %v2035_v39  ;;  %v2177_v56 = vadd.f32 %v4086_v37, %v2157_v61 }
 0x315   : > { %v2269_v9 = vpop.f32.mrf.mxu3 }
 0x316   : > { %v2270_v22 = vadd.f32 %v4091_v13, %v2269_v9  ;;  %v2135_v9 = vpop.f32.mrf.mxu2 }
 0x317   : > { %v2136_v27 = vadd.f32 %v2135_v9, %v2087_v53 }
 0x318   : > { %v2303_v29 = vadd.f32 %v2270_v22, %v2172_v38  ;;  %v2134_v38 = vadd.f32 %v2133_v32, %v2085_v41 }
 0x31a   : > { %v2319_v52 = vmax.f32 %v2303_v29, 0.0  ;;  %v2158_v55 = vadd.f32 %v2134_v38, %v4063_v14  ;;  %v2040_v29 = vpop.f32.mrf.mxu0  ;;  %v2089_v24 = vpop.f32.mrf.mxu1 }
 0x31c   : > { %2335 = vst [vmem:[%s4099_s21 + $0x20] sm:$0xff] %v2319_v52  ;;  %v2178_v5 = vadd.f32 %v4086_v37, %v2158_v55 }
 0x31d   : > { %v2271_v23 = vpop.f32.mrf.mxu3 }
 0x31e   : > { %v2272_v35 = vadd.f32 %v4091_v13, %v2271_v23 }
 0x320   : > { %v2304_v10 = vadd.f32 %v2272_v35, %v2173_v28  ;;  %v2138_v28 = vpop.f32.mrf.mxu2  ;;  %v2159_v35 = vadd.f32 %v2136_v27, %v4066_v21 }
 0x322   : > { %v2320_v0 = vmax.f32 %v2304_v10, 0.0  ;;  %v2090_v10 = vadd.f32 %v2089_v24, %v2040_v29  ;;  %v2042_v14 = vpop.f32.mrf.mxu0  ;;  %v2179_v30 = vadd.f32 %v4086_v37, %v2159_v35  ;;  %v2091_v62 = vpop.f32.mrf.mxu1 }
 0x323   : > { %v2092_v59 = vadd.f32 %v2091_v62, %v2042_v14 }
 0x324   : > { %2336 = vst [vmem:[%s4099_s21 + $0x28] sm:$0xff] %v2320_v0  ;;  %v2139_v43 = vadd.f32 %v2138_v28, %v2090_v10 }
 0x325   : > { %v2274_v60 = vpop.f32.mrf.mxu3 }
 0x326   : > { %v2275_v57 = vadd.f32 %v4091_v13, %v2274_v60 }
 0x328   : > { %v2305_v3 = vadd.f32 %v2275_v57, %v2174_v15  ;;  %v2160_v15 = vadd.f32 %v2139_v43, %v4070_v44  ;;  %v2140_v26 = vpop.f32.mrf.mxu2 }
 0x329   : > { %v2141_v31 = vadd.f32 %v2140_v26, %v2092_v59 }
 0x32a   : > { %v2321_v34 = vmax.f32 %v2305_v3, 0.0  ;;  %v2180_v3 = vadd.f32 %v4086_v37, %v2160_v15 }
 0x32c   : > { %2337 = vst [vmem:[%s4099_s21 + $0x30] sm:$0xff] %v2321_v34  ;;  %v2045_v34 = vpop.f32.mrf.mxu0 }
 0x32d   : > { %v2276_v33 = vpop.f32.mrf.mxu3 }
 0x32e   : > { %v2277_v46 = vadd.f32 %v4091_v13, %v2276_v33  ;;  %v2094_v33 = vpop.f32.mrf.mxu1 }
 0x32f   : > { %v2095_v44 = vadd.f32 %v2094_v33, %v2045_v34 }
 0x330   : > { %v2306_v45 = vadd.f32 %v2277_v46, %v2175_v8  ;;  %v2161_v8 = vadd.f32 %v2141_v31, %v4073_v18  ;;  %v2143_v39 = vpop.f32.mrf.mxu2 }
 0x331   : > { %v2144_v42 = vadd.f32 %v2143_v39, %v2095_v44 }
 0x332   : > { %v2322_v48 = vmax.f32 %v2306_v45, 0.0  ;;  %v2181_v45 = vadd.f32 %v4086_v37, %v2161_v8 }
 0x333   : > { %v2162_v32 = vadd.f32 %v2144_v42, %v4077_v7 }
 0x334   : > { %2338 = vst [vmem:[%s4099_s21 + $0x38] sm:$0xff] %v2322_v48  ;;  %v2047_v4 = vpop.f32.mrf.mxu0 }
 0x335   : > { %v2279_v58 = vpop.f32.mrf.mxu3  ;;  %v2182_v12 = vadd.f32 %v4086_v37, %v2162_v32 }
 0x336   : > { %v2280_v49 = vadd.f32 %v4091_v13, %v2279_v58  ;;  %v2096_v18 = vpop.f32.mrf.mxu1 }
 0x338   : > { %v2307_v25 = vadd.f32 %v2280_v49, %v2176_v47  ;;  %v2097_v47 = vadd.f32 %v2096_v18, %v2047_v4  ;;  %v2145_v36 = vpop.f32.mrf.mxu2 }
 0x33a   : > { %v2323_v1 = vmax.f32 %v2307_v25, 0.0  ;;  %v2146_v61 = vadd.f32 %v2145_v36, %v2097_v47 }
 0x33c   : > { %2339 = vst [vmem:[%s4099_s21 + $0x40] sm:$0xff] %v2323_v1  ;;  %v2163_v7 = vadd.f32 %v2146_v61, %v4080_v50 }
 0x33d   : > { %v2281_v2 = vpop.f32.mrf.mxu3 }
 0x33e   : > { %v2282_v54 = vadd.f32 %v4091_v13, %v2281_v2  ;;  %v2183_v2 = vadd.f32 %v4086_v37, %v2163_v7 }
 0x340   : > { %v2308_v22 = vadd.f32 %v2282_v54, %v2177_v56 }
 0x342   : > { %v2324_v16 = vmax.f32 %v2308_v22, 0.0 }
 0x344   : > { %2340 = vst [vmem:[%s4099_s21 + $0x48] sm:$0xff] %v2324_v16 }
 0x345   : > { %v2284_v52 = vpop.f32.mrf.mxu3 }
 0x346   : > { %v2285_v6 = vadd.f32 %v4091_v13, %v2284_v52 }
 0x348   : > { %v2309_v23 = vadd.f32 %v2285_v6, %v2178_v5 }
 0x34a   : > { %v2325_v11 = vmax.f32 %v2309_v23, 0.0 }
 0x34c   : > { %2341 = vst [vmem:[%s4099_s21 + $0x50] sm:$0xff] %v2325_v11 }
 0x34d   : > { %v2286_v40 = vpop.f32.mrf.mxu3 }
 0x34e   : > { %v2287_v0 = vadd.f32 %v4091_v13, %v2286_v40 }
 0x350   : > { %v2310_v60 = vadd.f32 %v2287_v0, %v2179_v30 }
 0x352   : > { %v2326_v57 = vmax.f32 %v2310_v60, 0.0 }
 0x354   : > { %2342 = vst [vmem:[%s4099_s21 + $0x58] sm:$0xff] %v2326_v57 }
 0x355   : > { %v2289_v21 = vpop.f32.mrf.mxu3 }
 0x356   : > { %v2290_v19 = vadd.f32 %v4091_v13, %v2289_v21 }
 0x358   : > { %v2311_v17 = vadd.f32 %v2290_v19, %v2180_v3 }
 0x35a   : > { %v2327_v46 = vmax.f32 %v2311_v17, 0.0 }
 0x35c   : > { %2343 = vst [vmem:[%s4099_s21 + $0x60] sm:$0xff] %v2327_v46 }
 0x35d   : > { %v2291_v20 = vpop.f32.mrf.mxu3 }
 0x35e   : > { %v2292_v63 = vadd.f32 %v4091_v13, %v2291_v20 }
 0x360   : > { %v2312_v48 = vadd.f32 %v2292_v63, %v2181_v45 }
 0x362   : > { %v2328_v58 = vmax.f32 %v2312_v48, 0.0 }
 0x364   : > { %2344 = vst [vmem:[%s4099_s21 + $0x68] sm:$0xff] %v2328_v58 }
 0x365   : > { %v2294_v49 = vpop.f32.mrf.mxu3 }
 0x366   : > { %v2295_v25 = vadd.f32 %v4091_v13, %v2294_v49 }
 0x368   : > { %v2313_v1 = vadd.f32 %v2295_v25, %v2182_v12 }
 0x36a   : > { %v2329_v51 = vmax.f32 %v2313_v1, 0.0 }
 0x36c   : > { %2345 = vst [vmem:[%s4099_s21 + $0x70] sm:$0xff] %v2329_v51 }
 0x36d   : > { %v2296_v41 = vpop.f32.mrf.mxu3 }
 0x36e   : > { %v2297_v56 = vadd.f32 %v4091_v13, %v2296_v41 }
 0x370   : > { %v2314_v54 = vadd.f32 %v2297_v56, %v2183_v2 }
 0x372   : > { %v2330_v9 = vmax.f32 %v2314_v54, 0.0 }
 0x374   : > { %2346 = vst [vmem:[%s4099_s21 + $0x78] sm:$0xff] %v2330_v9 }
 0x375   : > { %3104 = shalt.err (!%p3101_p9)
}
 0x376   : > { %s3174_s18 = smov 128   ;;  %s3175_s21 = smov 8  }
 0x377   : > { %2984 = dma.vmem_to_hbm [thread:$0]  (%p3267_p3), %s2364_s16, 2048, %s2366_s10, %s2348_s20, %s3174_s18, %s3174_s18, %s3175_s21  }
 0x378 PF: > { %p2990_p10 = scmp.ge.s32.totalorder %s3171_s8, 2  ;;  %s2380_s9 = sand.u32 1, %s3143_s24  }
 0x379   : > { %s2381_s17 = scalar_lea.sflag [#allocation3], %s2380_s9 }
 0x37a   : > { %p2987_p11 = pnand %p2990_p10, %p3276_p8 }
 0x37c   : > { %p2988_p12 = pneg %p2987_p11 }
 0x37e   : > { %3138 = dma.done.wait (%p2988_p12), %s2381_s17, 2048  }
 0x37f   : > { %3140 = vsyncadd (%p2988_p12), %s2381_s17, 4294965248  ;;  %s20_s8 = sadd.s32 1, %s3171_s8   ;;  %s4219_s24 = smov %s3147_s25 }
 0x380   : > { %p17_p13 = scmp.ge.s32.totalorder %s20_s8, 6   ;;  %s4220_s25 = smov %s3151_s26 }
 0x381   : > { %s4221_s26 = smov %s3285_s19  ;;  %s4222_s27 = smov %s3163_s29 }
 0x382   : > { %s4223_s28 = smov %s3167_s30  ;;  %s4224_s29 = smov %s4227_s11 }
 0x383   : > { %s4225_s30 = smov %s4231_s12  ;;  %19 = sbr.rel (!%p17_p13) target bundleno = 5 (0x5), region = 87 }
 0x388   :  { %2387 = vsyncpa [#allocation3], 1 }
 0x389   :  { %2389 = vsyncpa [#allocation3 + $0x1], 1 }

</bundles_post_ra>
